<compile_context>
chip_gen: v6e
topology: v6e:2x2x1
jax: 0.10.0
libtpu: 0.0.40
codegen_flags: <defaults>
</compile_context>

<pallas_src>
import math

import jax
import jax.numpy as jnp
import numpy as np
from jax import random
from jax.experimental import pallas as pl
from jax.experimental.pallas import tpu as pltpu


# ----------------------------- config ---------------------------------------
CONFIG = dict(
    n_layer=5,
    input_dim=3,
    output_dim=3,
    ff_sigma=128,
    ff_dim=12,                                  # ff_dim // input_dim = 4 freqs
    hidden_dim=[32, 32, 32, 32],
    modulated_layers=[1, 3],
    backbone_spatial_feature_dimensions=[64, 64],   # 8*8 spatial
    modulated_layers_to_backbone_features_map={1: 0, 3: 1},
    use_bias=True,
    normalize_weights=True,
)

_LANES = 128
_ROW_PAD = 16     # row padding works for both f32 (8) and bf16 (16) layouts


def _round_up(x, m):
    return (x + m - 1) // m * m


# ------------------------- deterministic params ------------------------------
def init_params(key, cfg):
    """Per-layer tuples: ('lin', W (in,out), b (1,out)) or
       ('mod', Wp (S,out), bp (1,out), mod_bias (1,out))."""
    params = []
    curr = cfg["ff_dim"] * 2
    mod_idx = 0
    for idx, c in enumerate(cfg["hidden_dim"]):
        if idx in cfg["modulated_layers"]:
            s = cfg["backbone_spatial_feature_dimensions"][mod_idx]
            key, k1, k2 = random.split(key, 3)
            wp = random.normal(k1, (s, c), jnp.float32) / math.sqrt(s)
            bp = random.normal(k2, (1, c), jnp.float32) * 0.01
            mb = jnp.ones((1, c), jnp.float32)          # torch.ones((1, c))
            params.append(("mod", wp, bp, mb))
            mod_idx += 1
        else:
            key, k1, k2 = random.split(key, 3)
            w = random.normal(k1, (curr, c), jnp.float32) / math.sqrt(curr)
            b = random.normal(k2, (1, c), jnp.float32) * 0.01
            params.append(("lin", w, b))
        curr = c
    key, k1, k2 = random.split(key, 3)
    wf = random.normal(k1, (curr, cfg["output_dim"]), jnp.float32) / math.sqrt(curr)
    bf = random.normal(k2, (1, cfg["output_dim"]), jnp.float32) * 0.01
    params.append(("lin", wf, bf))
    return params


# --------------------------- parameter packing --------------------------------
def pack_params(params, dtype):
    """Pack all small weights/biases into one (R, 128) slab of `dtype`.

    Returns (slab, plan).  plan mirrors params but each tensor becomes a
    static (row_offset, rows, cols) triple; all tensors are zero-padded to
    128 lanes so the final layer's weight/bias can be read out at any padded
    lane width.
    """
    blocks, plan, offset = [], [], 0

    def add(arr):
        nonlocal offset
        arr = jnp.asarray(arr, jnp.float32)
        r, c = arr.shape
        rp = _round_up(r, _ROW_PAD)
        blk = jnp.zeros((rp, _LANES), jnp.float32).at[:r, :c].set(arr)
        blocks.append(blk)
        entry = (offset, r, c)
        offset += rp
        return entry

    for prm in params:
        if prm[0] == "lin":
            _, w, b = prm
            plan.append(("lin", add(w), add(b)))
        else:
            _, wp, bp, mb = prm
            plan.append(("mod", add(wp), add(bp), add(mb)))
    slab = jnp.concatenate(blocks, axis=0).astype(dtype)
    return slab, plan


# ------------------------------ Pallas kernel --------------------------------
def make_kernel(cfg, plan, n_mod, TB, TN, hoist_mod, use_bf16, out_lanes):
    hidden = cfg["hidden_dim"]
    ff_dim = cfg["ff_dim"]
    mm_dtype = jnp.bfloat16 if use_bf16 else jnp.float32

    def mm(a, b):
        # bf16 MXU inputs on v6e/v7x (weights already packed in bf16 so the
        # cast below is a no-op for them); f32 accumulation always.
        return jnp.dot(a.astype(mm_dtype), b.astype(mm_dtype),
                       preferred_element_type=jnp.float32)

    def kernel(arg_ref, *rest):
        feat_refs = rest[:n_mod]
        slab_ref = rest[n_mod]
        out_ref = rest[n_mod + 1]
        scratch = rest[n_mod + 2:]
        wmod_refs = scratch[:n_mod] if hoist_mod else ()
        zbuf = scratch[-1] if (TB > 1 and n_mod > 0) else None

        def read(entry, cols=None):
            off, r, c = entry
            return slab_ref[off:off + r, :(c if cols is None else cols)]

        def compute_wmod(entry, m, tb):
            # per-sample modulated weight: normalize(feat) @ Wp + bp -> (C, c)
            _, wp_e, bp_e, _ = entry
            feat = feat_refs[m][tb].astype(jnp.float32)        # (C, S)
            if cfg["normalize_weights"]:
                nrm = jnp.sqrt(jnp.sum(feat * feat, axis=0, keepdims=True))
                feat = feat / jnp.maximum(nrm, 1e-12)
            return mm(feat, read(wp_e)) + read(bp_e).astype(jnp.float32)

        # ---- per-sample modulated weights, hoisted across N tiles -----------
        if hoist_mod:
            @pl.when(pl.program_id(1) == 0)
            def _():
                m = 0
                for idx in range(len(hidden)):
                    if plan[idx][0] == "mod":
                        wmod_refs[m][...] = compute_wmod(plan[idx], m, 0)
                        m += 1

        # ---- fourier features (argument shipped, cos/sin in-kernel) ---------
        a = arg_ref[...]                                       # (TM, ff_dim)
        ca, sa = jnp.cos(a), jnp.sin(a)

        start = 0
        if plan[0][0] == "lin":
            # split the first weight into its cos rows and sin rows so the
            # 2*ff_dim lane concat is never materialized.
            _, w_e, b_e = plan[0]
            off, r0, c0 = w_e                                  # r0 == 2*ff_dim
            w0 = slab_ref[off:off + r0, :c0]
            z = jnp.maximum(mm(ca, w0[:ff_dim]) + mm(sa, w0[ff_dim:])
                            + read(b_e).astype(jnp.float32), 0.0)
            start = 1
        else:
            z = jnp.concatenate([ca, sa], axis=-1)             # generic fallback

        # ---- MLP (modulated layers have no ReLU, matching nn.Identity) ------
        m = 0
        for idx in range(start, len(hidden)):
            entry = plan[idx]
            if entry[0] == "mod":
                c = hidden[idx]
                mb = read(entry[3]).astype(jnp.float32)
                if TB == 1:
                    w_mod = (wmod_refs[m][...] if hoist_mod
                             else compute_wmod(entry, m, 0))
                    z = mm(z, w_mod)
                    if cfg["use_bias"]:
                        # == cat([z, ones]) @ cat([w_mod, mod_bias], dim=0)
                        z = z + mb
                else:
                    # write each per-sample result into its row slice of a
                    # preallocated VMEM buffer (no sublane concat).
                    for tb in range(TB):
                        w_mod = compute_wmod(entry, m, tb)
                        zz = mm(z[tb * TN:(tb + 1) * TN, :], w_mod)
                        if cfg["use_bias"]:
                            zz = zz + mb
                        zbuf[tb * TN:(tb + 1) * TN, :c] = zz
                    z = zbuf[:, :c]
                m += 1
            else:
                _, w_e, b_e = entry
                z = jnp.maximum(mm(z, read(w_e)) + read(b_e).astype(jnp.float32),
                                0.0)

        # ---- final Linear (zero-padded to out_lanes) + sigmoid ---------------
        _, wf_e, bf_e = plan[-1]
        z = mm(z, read(wf_e, out_lanes)) + read(bf_e, out_lanes).astype(jnp.float32)
        out_ref[...] = jax.nn.sigmoid(z).astype(out_ref.dtype)

    return kernel


def _choose_tiling(B, n_pad, max_rows=2048, min_parallel=2):
    """Pick (TB samples, TN rows/sample, padded rows/sample) per grid step."""
    if n_pad > max_rows:
        tn = max_rows
        return 1, tn, _round_up(n_pad, tn)      # pad N up instead of shrinking TN
    # Small per-sample row count: fold samples into one tile, but keep at least
    # `min_parallel` blocks on the batch axis so both v7x TensorCores get work.
    tb_max = max(1, min(B // min_parallel, max_rows // n_pad))
    tb = 1
    for cand in range(tb_max, 0, -1):
        if B % cand == 0:
            tb = cand
            break
    return tb, n_pad, n_pad


# ------------------------------- wrapper --------------------------------------
def forward_pallas(coord, features, params, cfg, *, use_bf16_matmul=False):
    B, N, idim = coord.shape
    ff_dim = cfg["ff_dim"]
    ffp = ff_dim // idim
    out_dim = cfg["output_dim"]
    out_lanes = _round_up(out_dim, 8)
    out_dtype = jnp.bfloat16 if use_bf16_matmul else jnp.float32
    slab_dtype = jnp.bfloat16 if use_bf16_matmul else jnp.float32

    # Fourier argument (exact elementwise product, f32); cos/sin and the lane
    # duplication happen in-kernel so only ff_dim lanes/row hit HBM.
    freqs = jnp.exp(jnp.linspace(0.0, math.log(cfg["ff_sigma"]), ffp)
                    ).astype(jnp.float32)
    ffarg = (coord[..., None] * freqs).reshape(B, N, ff_dim)

    n_pad0 = _round_up(N, _ROW_PAD)
    TB, TN, n_pad = _choose_tiling(B, n_pad0)
    TM = TB * TN
    nts = n_pad // TN
    grid = (B // TB, nts)
    # Hoist per-sample modulated weights across N tiles only when the batch
    # axis alone already provides >= 2 parallel blocks; otherwise recompute
    # per step so BOTH axes can be "parallel" (keeps both v7x cores busy).
    hoist_mod = (nts > 1) and (B // TB >= 2)

    if n_pad != N:
        ffarg = jnp.pad(ffarg, ((0, 0), (0, n_pad - N), (0, 0)))
    ffarg_flat = ffarg.reshape(B * n_pad, ff_dim)

    # backbone features per modulated layer (flattened NCHW -> B, C, S)
    feat_flats, mod_idxs = [], []
    for idx in range(len(cfg["hidden_dim"])):
        if idx in cfg["modulated_layers"]:
            fidx = cfg["modulated_layers_to_backbone_features_map"][idx]
            f = features[fidx]
            feat_flats.append(
                f.reshape(f.shape[0], f.shape[1], -1).astype(jnp.float32))
            mod_idxs.append(idx)
    n_mod = len(feat_flats)

    slab, plan = pack_params(params, slab_dtype)

    in_specs = [pl.BlockSpec((TM, ff_dim), lambda bt, nt: (bt * nts + nt, 0))]
    for f in feat_flats:
        in_specs.append(pl.BlockSpec((TB,) + f.shape[1:],
                                     lambda bt, nt: (bt, 0, 0)))
    in_specs.append(pl.BlockSpec(slab.shape, lambda bt, nt: (0, 0)))

    scratch = []
    if hoist_mod:
        for idx, f in zip(mod_idxs, feat_flats):
            scratch.append(
                pltpu.VMEM((f.shape[1], cfg["hidden_dim"][idx]), jnp.float32))
    elif TB > 1 and n_mod > 0:
        cmax = max(cfg["hidden_dim"][idx] for idx in mod_idxs)
        scratch.append(pltpu.VMEM((TM, cmax), jnp.float32))

    kernel = make_kernel(cfg, plan, n_mod, TB, TN, hoist_mod,
                         use_bf16_matmul, out_lanes)

    out_flat = pl.pallas_call(
        kernel,
        out_shape=jax.ShapeDtypeStruct((B * n_pad, out_lanes), out_dtype),
        grid_spec=pltpu.PrefetchScalarGridSpec(
            num_scalar_prefetch=0,
            grid=grid,
            in_specs=in_specs,
            out_specs=pl.BlockSpec((TM, out_lanes),
                                   lambda bt, nt: (bt * nts + nt, 0)),
            scratch_shapes=scratch),
        compiler_params=pltpu.CompilerParams(
            dimension_semantics=(("parallel", "arbitrary") if hoist_mod
                                 else ("parallel", "parallel")),
            vmem_limit_bytes=32 * 1024 * 1024),
    )(ffarg_flat, *feat_flats, slab)

    out = out_flat.reshape(B, n_pad, out_lanes)
    # padded N rows and padded output lanes (sigmoid(0)=0.5) are sliced off
    return out[:, :N, :out_dim]


# -------------------------- pure-JAX reference --------------------------------
def forward_ref(coord, features, params, cfg):
    """Faithful translation of the PyTorch forward (ones/mod_bias concat),
    with HIGHEST-precision f32 matmuls so it is a trustworthy baseline."""
    P = jax.lax.Precision.HIGHEST
    idim = cfg["input_dim"]
    ffp = cfg["ff_dim"] // idim
    freqs = jnp.exp(jnp.linspace(0.0, math.log(cfg["ff_sigma"]), ffp)
                    ).astype(jnp.float32)
    ff = (coord[..., None] * freqs).reshape(*coord.shape[:-1], -1)
    z = jnp.concatenate([jnp.cos(ff), jnp.sin(ff)], axis=-1)
    for idx in range(len(cfg["hidden_dim"])):
        kind, *ps = params[idx]
        if kind == "mod":
            wp, bp, mb = ps
            fidx = cfg["modulated_layers_to_backbone_features_map"][idx]
            feat = features[fidx]
            if cfg["normalize_weights"]:
                nrm = jnp.sqrt(jnp.sum(feat * feat, axis=1, keepdims=True))
                feat = feat / jnp.maximum(nrm, 1e-12)
            Bsz, C = feat.shape[:2]
            pf = jnp.matmul(feat.reshape(Bsz, C, -1), wp, precision=P) + bp
            pf = pf.reshape(z.shape[0], z.shape[2], -1)
            if cfg["use_bias"]:
                ones = jnp.ones((*z.shape[:-1], 1), z.dtype)
                z = jnp.concatenate([z, ones], axis=-1)
                pf = jnp.concatenate(
                    [pf, jnp.tile(mb[None], (z.shape[0], 1, 1))], axis=1)
            z = jnp.einsum("bnc,bck->bnk", z, pf, precision=P)
        else:
            w, b = ps
            z = jnp.maximum(jnp.matmul(z, w, precision=P) + b, 0.0)
    _, wf, bf = params[-1]
    z = jnp.matmul(z, wf, precision=P) + bf
    return jax.nn.sigmoid(z)


# ------------------------------------ main ------------------------------------
def _make_inputs(key, cfg, B, N, H, W):
    kc, kf0, kf1 = random.split(key, 3)
    coord = random.uniform(kc, (B, N, cfg["input_dim"]), jnp.float32, -1.0, 1.0)
    features = [
        random.normal(kf0, (B, cfg["hidden_dim"][0], H, W), jnp.float32),  # layer 1
        random.normal(kf1, (B, cfg["hidden_dim"][2], H, W), jnp.float32),  # layer 3
    ]
    return coord, features


if __name__ == "__main__":
    cfg = CONFIG
    key = random.PRNGKey(0)
    kp, kin = random.split(key)
    params = init_params(kp, cfg)

    def check(B, N, use_bf16, atol, rtol, subkey):
        coord, features = _make_inputs(subkey, cfg, B, N, 8, 8)
        ref = np.asarray(forward_ref(coord, features, params, cfg)).astype(np.float32)
        out = forward_pallas(coord, features, params, cfg,
                             use_bf16_matmul=use_bf16)
        out = jax.block_until_ready(out)
        out = np.asarray(out).astype(np.float32)
        assert out.shape == (B, N, cfg["output_dim"])
        np.testing.assert_allclose(out, ref, atol=atol, rtol=rtol)

    k1, k2, k3, k4 = random.split(kin, 4)
    # f32 MXU path, basic shape (TB==1, single N tile, 2 parallel batch blocks).
    check(B=2, N=64, use_bf16=False, atol=1e-4, rtol=1e-4, subkey=k1)
    # large N: TN=2048 tiles, N padded up, hoisted modulated weights (batch
    # axis parallel, N-tile axis arbitrary).
    check(B=2, N=2100, use_bf16=False, atol=1e-4, rtol=1e-4, subkey=k2)
    # B=1 with multiple N tiles: modulated weights recomputed per step so both
    # grid axes stay parallel (v7x megacore).
    check(B=1, N=3000, use_bf16=False, atol=1e-4, rtol=1e-4, subkey=k3)
    # sample-folding path (TB>1, zbuf scratch, odd N) with bf16 MXU inputs,
    # bf16 weight slab and bf16 output (f32 accumulation).
    check(B=4, N=37, use_bf16=True, atol=2e-2, rtol=2e-2, subkey=k4)

    # TODO(synk): compute_loss (MSE reduction) is training-only glue, left out of the kernel.
    print("KERNEL_OK")
</pallas_src>

<mosaic_0001>
module attributes {stable_mosaic.version = 11 : i64} {
  func.func @kernel(%arg0: i32, %arg1: i32, %arg2: memref<64x12xf32, #tpu.memory_space<vmem>>, %arg3: memref<1x32x64xf32, #tpu.memory_space<vmem>>, %arg4: memref<1x32x64xf32, #tpu.memory_space<vmem>>, %arg5: memref<336x128xf32, #tpu.memory_space<vmem>>, %arg6: memref<64x8xf32, #tpu.memory_space<vmem>>) attributes {dimension_semantics = [#tpu.dimension_semantics<parallel>, #tpu.dimension_semantics<parallel>], iteration_bounds = array<i64: 2, 1>, scalar_prefetch = 0 : i64, scratch_operands = 0 : i64, tpu.core_type = #tpu.core_type<tc>, window_params = [{transform_indices = @transform_0, window_bounds = array<i64: 64, 12>}, {transform_indices = @transform_1, window_bounds = array<i64: 1, 32, 64>}, {transform_indices = @transform_2, window_bounds = array<i64: 1, 32, 64>}, {pipeline_mode = #tpu.pipeline_mode<synchronous>, transform_indices = @transform_3, window_bounds = array<i64: 336, 128>}, {transform_indices = @transform_4, window_bounds = array<i64: 64, 8>}]} {
    %c0 = arith.constant 0 : index
    %c0_0 = arith.constant 0 : index
    %0 = vector.load %arg2[%c0, %c0_0] : memref<64x12xf32, #tpu.memory_space<vmem>>, vector<64x12xf32>
    %1 = math.cos %0 : vector<64x12xf32>
    %2 = math.sin %0 : vector<64x12xf32>
    %c0_1 = arith.constant 0 : index
    %c0_2 = arith.constant 0 : index
    %3 = vector.load %arg5[%c0_1, %c0_2] : memref<336x128xf32, #tpu.memory_space<vmem>>, vector<24x32xf32>
    %4 = vector.extract_strided_slice %3 {offsets = [0, 0], sizes = [12, 32], strides = [1, 1]} : vector<24x32xf32> to vector<12x32xf32>
    %cst = arith.constant dense<0.000000e+00> : vector<64x32xf32>
    %5 = tpu.matmul %1, %4, %cst {dimension_numbers = #tpu.dot_dimension_numbers<[1], [0], [0], [1], [0, 0, 1, 1], [], []>} : vector<64x12xf32>, vector<12x32xf32>, vector<64x32xf32> -> vector<64x32xf32>
    %6 = vector.extract_strided_slice %3 {offsets = [12, 0], sizes = [12, 32], strides = [1, 1]} : vector<24x32xf32> to vector<12x32xf32>
    %cst_3 = arith.constant dense<0.000000e+00> : vector<64x32xf32>
    %7 = tpu.matmul %2, %6, %cst_3 {dimension_numbers = #tpu.dot_dimension_numbers<[1], [0], [0], [1], [0, 0, 1, 1], [], []>} : vector<64x12xf32>, vector<12x32xf32>, vector<64x32xf32> -> vector<64x32xf32>
    %8 = arith.addf %5, %7 : vector<64x32xf32>
    %c32 = arith.constant 32 : index
    %c0_4 = arith.constant 0 : index
    %9 = vector.load %arg5[%c32, %c0_4] : memref<336x128xf32, #tpu.memory_space<vmem>>, vector<1x32xf32>
    %10 = vector.broadcast %9 : vector<1x32xf32> to vector<64x32xf32>
    %11 = arith.addf %8, %10 : vector<64x32xf32>
    %cst_5 = arith.constant 0.000000e+00 : f32
    %12 = vector.broadcast %cst_5 : f32 to vector<64x32xf32>
    %13 = arith.maximumf %11, %12 : vector<64x32xf32>
    %c128 = arith.constant 128 : index
    %c0_6 = arith.constant 0 : index
    %14 = vector.load %arg5[%c128, %c0_6] : memref<336x128xf32, #tpu.memory_space<vmem>>, vector<1x32xf32>
    %c0_7 = arith.constant 0 : index
    %c0_8 = arith.constant 0 : index
    %c0_9 = arith.constant 0 : index
    %15 = vector.load %arg3[%c0_7, %c0_8, %c0_9] : memref<1x32x64xf32, #tpu.memory_space<vmem>>, vector<1x32x64xf32>
    %16 = vector.shape_cast %15 : vector<1x32x64xf32> to vector<32x64xf32>
    %17 = arith.mulf %16, %16 : vector<32x64xf32>
    %cst_10 = arith.constant dense<0.000000e+00> : vector<64xf32>
    %18 = vector.multi_reduction <add>, %17, %cst_10 [0] : vector<32x64xf32> to vector<64xf32>
    %19 = vector.shape_cast %18 : vector<64xf32> to vector<1x64xf32>
    %20 = math.sqrt %19 : vector<1x64xf32>
    %cst_11 = arith.constant 9.99999996E-13 : f32
    %21 = vector.broadcast %cst_11 : f32 to vector<1x64xf32>
    %22 = arith.maximumf %20, %21 : vector<1x64xf32>
    %23 = vector.broadcast %22 : vector<1x64xf32> to vector<32x64xf32>
    %24 = arith.divf %16, %23 : vector<32x64xf32>
    %c48 = arith.constant 48 : index
    %c0_12 = arith.constant 0 : index
    %25 = vector.load %arg5[%c48, %c0_12] : memref<336x128xf32, #tpu.memory_space<vmem>>, vector<64x32xf32>
    %cst_13 = arith.constant dense<0.000000e+00> : vector<32x32xf32>
    %26 = tpu.matmul %24, %25, %cst_13 {dimension_numbers = #tpu.dot_dimension_numbers<[1], [0], [0], [1], [0, 0, 1, 1], [], []>} : vector<32x64xf32>, vector<64x32xf32>, vector<32x32xf32> -> vector<32x32xf32>
    %c112 = arith.constant 112 : index
    %c0_14 = arith.constant 0 : index
    %27 = vector.load %arg5[%c112, %c0_14] : memref<336x128xf32, #tpu.memory_space<vmem>>, vector<1x32xf32>
    %28 = vector.broadcast %27 : vector<1x32xf32> to vector<32x32xf32>
    %29 = arith.addf %26, %28 : vector<32x32xf32>
    %cst_15 = arith.constant dense<0.000000e+00> : vector<64x32xf32>
    %30 = tpu.matmul %13, %29, %cst_15 {dimension_numbers = #tpu.dot_dimension_numbers<[1], [0], [0], [1], [0, 0, 1, 1], [], []>} : vector<64x32xf32>, vector<32x32xf32>, vector<64x32xf32> -> vector<64x32xf32>
    %31 = vector.broadcast %14 : vector<1x32xf32> to vector<64x32xf32>
    %32 = arith.addf %30, %31 : vector<64x32xf32>
    %c144 = arith.constant 144 : index
    %c0_16 = arith.constant 0 : index
    %33 = vector.load %arg5[%c144, %c0_16] : memref<336x128xf32, #tpu.memory_space<vmem>>, vector<32x32xf32>
    %cst_17 = arith.constant dense<0.000000e+00> : vector<64x32xf32>
    %34 = tpu.matmul %32, %33, %cst_17 {dimension_numbers = #tpu.dot_dimension_numbers<[1], [0], [0], [1], [0, 0, 1, 1], [], []>} : vector<64x32xf32>, vector<32x32xf32>, vector<64x32xf32> -> vector<64x32xf32>
    %c176 = arith.constant 176 : index
    %c0_18 = arith.constant 0 : index
    %35 = vector.load %arg5[%c176, %c0_18] : memref<336x128xf32, #tpu.memory_space<vmem>>, vector<1x32xf32>
    %36 = vector.broadcast %35 : vector<1x32xf32> to vector<64x32xf32>
    %37 = arith.addf %34, %36 : vector<64x32xf32>
    %cst_19 = arith.constant 0.000000e+00 : f32
    %38 = vector.broadcast %cst_19 : f32 to vector<64x32xf32>
    %39 = arith.maximumf %37, %38 : vector<64x32xf32>
    %c272 = arith.constant 272 : index
    %c0_20 = arith.constant 0 : index
    %40 = vector.load %arg5[%c272, %c0_20] : memref<336x128xf32, #tpu.memory_space<vmem>>, vector<1x32xf32>
    %c0_21 = arith.constant 0 : index
    %c0_22 = arith.constant 0 : index
    %c0_23 = arith.constant 0 : index
    %41 = vector.load %arg4[%c0_21, %c0_22, %c0_23] : memref<1x32x64xf32, #tpu.memory_space<vmem>>, vector<1x32x64xf32>
    %42 = vector.shape_cast %41 : vector<1x32x64xf32> to vector<32x64xf32>
    %43 = arith.mulf %42, %42 : vector<32x64xf32>
    %cst_24 = arith.constant dense<0.000000e+00> : vector<64xf32>
    %44 = vector.multi_reduction <add>, %43, %cst_24 [0] : vector<32x64xf32> to vector<64xf32>
    %45 = vector.shape_cast %44 : vector<64xf32> to vector<1x64xf32>
    %46 = math.sqrt %45 : vector<1x64xf32>
    %cst_25 = arith.constant 9.99999996E-13 : f32
    %47 = vector.broadcast %cst_25 : f32 to vector<1x64xf32>
    %48 = arith.maximumf %46, %47 : vector<1x64xf32>
    %49 = vector.broadcast %48 : vector<1x64xf32> to vector<32x64xf32>
    %50 = arith.divf %42, %49 : vector<32x64xf32>
    %c192 = arith.constant 192 : index
    %c0_26 = arith.constant 0 : index
    %51 = vector.load %arg5[%c192, %c0_26] : memref<336x128xf32, #tpu.memory_space<vmem>>, vector<64x32xf32>
    %cst_27 = arith.constant dense<0.000000e+00> : vector<32x32xf32>
    %52 = tpu.matmul %50, %51, %cst_27 {dimension_numbers = #tpu.dot_dimension_numbers<[1], [0], [0], [1], [0, 0, 1, 1], [], []>} : vector<32x64xf32>, vector<64x32xf32>, vector<32x32xf32> -> vector<32x32xf32>
    %c256 = arith.constant 256 : index
    %c0_28 = arith.constant 0 : index
    %53 = vector.load %arg5[%c256, %c0_28] : memref<336x128xf32, #tpu.memory_space<vmem>>, vector<1x32xf32>
    %54 = vector.broadcast %53 : vector<1x32xf32> to vector<32x32xf32>
    %55 = arith.addf %52, %54 : vector<32x32xf32>
    %cst_29 = arith.constant dense<0.000000e+00> : vector<64x32xf32>
    %56 = tpu.matmul %39, %55, %cst_29 {dimension_numbers = #tpu.dot_dimension_numbers<[1], [0], [0], [1], [0, 0, 1, 1], [], []>} : vector<64x32xf32>, vector<32x32xf32>, vector<64x32xf32> -> vector<64x32xf32>
    %57 = vector.broadcast %40 : vector<1x32xf32> to vector<64x32xf32>
    %58 = arith.addf %56, %57 : vector<64x32xf32>
    %c288 = arith.constant 288 : index
    %c0_30 = arith.constant 0 : index
    %59 = vector.load %arg5[%c288, %c0_30] : memref<336x128xf32, #tpu.memory_space<vmem>>, vector<32x8xf32>
    %cst_31 = arith.constant dense<0.000000e+00> : vector<64x8xf32>
    %60 = tpu.matmul %58, %59, %cst_31 {dimension_numbers = #tpu.dot_dimension_numbers<[1], [0], [0], [1], [0, 0, 1, 1], [], []>} : vector<64x32xf32>, vector<32x8xf32>, vector<64x8xf32> -> vector<64x8xf32>
    %c320 = arith.constant 320 : index
    %c0_32 = arith.constant 0 : index
    %61 = vector.load %arg5[%c320, %c0_32] : memref<336x128xf32, #tpu.memory_space<vmem>>, vector<1x8xf32>
    %62 = vector.broadcast %61 : vector<1x8xf32> to vector<64x8xf32>
    %63 = arith.addf %60, %62 : vector<64x8xf32>
    %64 = arith.negf %63 : vector<64x8xf32>
    %65 = math.exp %64 : vector<64x8xf32>
    %cst_33 = arith.constant 1.000000e+00 : f32
    %66 = vector.broadcast %cst_33 : f32 to vector<64x8xf32>
    %67 = arith.addf %66, %65 : vector<64x8xf32>
    %68 = arith.divf %66, %67 : vector<64x8xf32>
    %c0_34 = arith.constant 0 : index
    %c0_35 = arith.constant 0 : index
    %69 = vector.load %arg6[%c0_34, %c0_35] : memref<64x8xf32, #tpu.memory_space<vmem>>, vector<64x8xf32>
    tpu.vector_store %arg6[%c0_34, %c0_35], %68 {strides = array<i32>} : memref<64x8xf32, #tpu.memory_space<vmem>>, vector<64x8xf32>,
    return
  }
  func.func @transform_0(%arg0: i32, %arg1: i32) -> (i32, i32) {
    %c1_i32 = arith.constant 1 : i32
    %0 = arith.muli %arg0, %c1_i32 : i32
    %1 = arith.addi %0, %arg1 : i32
    %c0_i32 = arith.constant 0 : i32
    %c0_i32_0 = arith.constant 0 : i32
    return %1, %c0_i32 : i32, i32
  }
  func.func @transform_1(%arg0: i32, %arg1: i32) -> (i32, i32, i32) {
    %c0_i32 = arith.constant 0 : i32
    %c0_i32_0 = arith.constant 0 : i32
    %c0_i32_1 = arith.constant 0 : i32
    return %arg0, %c0_i32, %c0_i32_0 : i32, i32, i32
  }
  func.func @transform_2(%arg0: i32, %arg1: i32) -> (i32, i32, i32) {
    %c0_i32 = arith.constant 0 : i32
    %c0_i32_0 = arith.constant 0 : i32
    %c0_i32_1 = arith.constant 0 : i32
    return %arg0, %c0_i32, %c0_i32_0 : i32, i32, i32
  }
  func.func @transform_3(%arg0: i32, %arg1: i32) -> (i32, i32) {
    %c0_i32 = arith.constant 0 : i32
    %c0_i32_0 = arith.constant 0 : i32
    %c0_i32_1 = arith.constant 0 : i32
    return %c0_i32, %c0_i32_0 : i32, i32
  }
  func.func @transform_4(%arg0: i32, %arg1: i32) -> (i32, i32) {
    %c1_i32 = arith.constant 1 : i32
    %0 = arith.muli %arg0, %c1_i32 : i32
    %1 = arith.addi %0, %arg1 : i32
    %c0_i32 = arith.constant 0 : i32
    %c0_i32_0 = arith.constant 0 : i32
    return %1, %c0_i32 : i32, i32
  }
}

</mosaic_0001>

<bundles_post_ra>
// kernel: tpu_custom_call.1
= control target key start
LH: loop header
LB: loop body
LE: loop exit
PB: predicated region body
PF: predicated region fallthrough
CT: control target
= control target key end

     0   :  { %9 = vsyncpa [#allocation3], 0  ;;  %s3880_s15 = smov 0   ;;  %s3882_s16 = smov 0   ;;  %s4875_s0 = inlined_call_operand.vmem [shape: f32[128,12], index: 0, kind: input, shape index: {}]   ;;  %s4876_s1 = inlined_call_operand.vmem [shape: f32[2,32,64], index: 1, kind: input, shape index: {}]   ;;  %s4877_s2 = inlined_call_operand.vmem [shape: f32[2,32,64], index: 2, kind: input, shape index: {}]   ;;  %s4878_s3 = inlined_call_operand.hbm [shape: f32[336,128], index: 3, kind: input, shape index: {}]   ;;  %s4879_s4 = inlined_call_operand.vmem [shape: f32[128,8], index: 4, kind: output, shape index: {}]  }
   0x1   :  { %s3884_s17 = smov 0  }
   0x2 LB: > { %s3241_s18 = sadd.s32 4294967295, %s3844_s17   ;;  %s27_s19 = sadd.s32 1, %s3840_s16  ;;  %s3844_s17 = sphi %s3884_s17, %s15_s17   ;;  %s3840_s16 = sphi %s3882_s16, %s4895_s16   ;;  %s3836_s15 = sphi %s3880_s15, %s4894_s15  }
   0x3   : > { %p29_p0 = scmp.ge.s32.totalorder %s27_s19, 2  ;;  %p3243_p1 = scmp.ge.s32.totalorder %s3844_s17, 1 }
   0x4   : > { %p161_p2 = scmp.lt.s32.totalorder %s3844_s17, 3  ;;  %p3905_p4 = scmp.eq.s32.totalorder %s3241_s18, 0 }
   0x5   : > { %s4897_s19 = smov (%p29_p0, %s27_s19), 0  ;;  %s3846_s22 = smov [#allocation2]  }
   0x6   : > { %p3901_p3 = pnand %p3243_p1, %p161_p2  ;;  %s173_s23 = sshll.u32 %s3846_s22, 4  ;;  %s174_s23 = int_to_ptr.vmem [resolvable:$true] %s173_s23 }
   0x7   : > { %s3803_s24 = scalar_lea.vmem %s174_s23, 5376  ;;  %p3811_p11 = scmp.lt.s32.totalorder %s174_s23, %s174_s23 }
   0x8   : > { %p3681_p5 = pneg %p3901_p3  ;;  %p3804_p8 = scmp.ne.s32.totalorder %s174_s23, %s3803_s24 }
   0x9   : > { %p3812_p12 = scmp.lt.s32.totalorder %s3803_s24, %s3803_s24 }
   0xa   : > { %p3682_p6 = pnand %p3905_p4, %p3681_p5 }
   0xb   : > { %p3813_p13 = por %p3812_p12, %p3811_p11 }
   0xc   : > { %p3794_p7 = pneg %p3682_p6 }
   0xe   : > { %p3806_p9 = pnand %p3804_p8, %p3794_p7 }
  0x10   : > { %p3807_p10 = pneg %p3806_p9 }
  0x12   : > { %p3814_p0 = pnand %p3813_p13, %p3807_p10 }
  0x14   : > { %3817 = shalt.err (!%p3814_p0)
}
  0x15   : > { %s3847_s25 = smov 128   ;;  %s3848_s26 = smov 8  }
  0x16   : > { %3684 = dma.hbm_to_vmem [thread:$0]  (!%p3682_p6), %s4878_s3, 5376, %s174_s23, [#allocation3], %s3847_s25, %s3847_s25, %s3848_s26  }
  0x17   : > { %216 = sbr.rel (%p3901_p3) target bundleno = 1337 (0x539), region = 36 }
  0x1c   : > { %3831 = dma.done.wait (%p3905_p4), [#allocation3], 5376  }
  0x1d   : > { %3833 = vsyncadd (%p3905_p4), [#allocation3], 4294961920  ;;  %s3248_s29 = sshll.u32 %s3836_s15, 3  ;;  %vm1949_vm0 = vcmask 1043456   ;;  %v1946_v0 = vld [vmem:[#allocation2 + $0x10] sm:$0xff]  ;;  %v1945_v1 = vld [vmem:[#allocation2 + $0x8] sm:$0xff] }
  0x1e   : > { %p256_p1 = scmp.lt.s32.totalorder %s3248_s29, 15  ;;  %v1944_v2 = vld [vmem:[#allocation2] sm:$0xff]  ;;  %v1951_v3 = vrot.slane %v1946_v0, 4  ;;  %v1950_v4 = vrot.slane %v1945_v1, 4  ;;  %3505 = vmatprep.subr.msk.mxu1 %vm1949_vm0, %v1945_v1  ;;  %v3951_v14 = vld [vmem:[#allocation2 + $0x68] sm:$0xff]  ;;  %p262_p2 = scmp.lt.s32.totalorder %s3836_s15, 1 }
  0x1f   : > { %3506 = vmatpush3.msk.msra.mxu1 %vm1949_vm0, %v1945_v1  ;;  %v3849_v37 = vmov 683565275   ;;  %v3850_v39 = vmov 2475754826   ;;  %v3851_v41 = vmov 2131351028  }
  0x20   : > { %s4899_s29 = smov (!%p256_p1, %s3248_s29), 15  ;;  %3489 = vmatprep.subr.msk.mxu0 %vm1949_vm0, %v1951_v3  ;;  %v1952_v9 = vsel %vm1949_vm0, %v1950_v4, %v1951_v3  ;;  %3507 = vmatprep.subr.mxu1 %v1944_v2  ;;  %v3852_v43 = vmov 2102212464   ;;  %v3853_v45 = vmov 920167782   ;;  %s4901_s15 = smov (!%p262_p2, %s3836_s15), 1 }
  0x21   : > { %s3249_s30 = sshll.u32 %s4899_s29, 3  ;;  %3490 = vmatpush3.msk.msra.mxu0 %vm1949_vm0, %v1951_v3  ;;  %3508 = vmatpush3.msra.mxu1 %v1944_v2  ;;  %v3854_v53 = vmov 1326507024   ;;  %s3395_s8 = sshll.u32 %s4901_s15, 5 }
  0x22   : > { %s3931_s7 = scalar_lea.vmem %s4875_s0, %s3249_s30  ;;  %3491 = vmatprep.subr.mxu0 %v1952_v9  ;;  %s4615_s11 = scalar_lea.vmem %s4876_s1, %s3395_s8 }
  0x23   : > { %v3935_v5 = vld [vmem:[%s3931_s7] sm:$0xff]  ;;  %v3938_v6 = vld [vmem:[%s3931_s7 + $0x8] sm:$0xff]  ;;  %v3948_v12 = vld [vmem:[%s3931_s7 + $0x10] sm:$0xff]  ;;  %3492 = vmatpush3.msra.mxu0 %v1952_v9  ;;  %s271_s14 = scalar_lea.vmem %s4877_s2, %s3395_s8  ;;  %s277_s20 = scalar_lea.vmem %s4879_s4, %s3249_s30 }
  0x24   : > { %v288_v7 = vand.u32 2147483647, %v3935_v5  ;;  %v291_v8 = vand.u32 2139095040, %v3935_v5  ;;  %v391_v10 = vand.u32 2147483647, %v3938_v6  ;;  %v394_v11 = vand.u32 2139095040, %v3938_v6  ;;  %3521 = vmatprep.subr.mxu0 %v3951_v14 }
  0x25   : > { %v497_v19 = vand.u32 2139095040, %v3948_v12  ;;  %v494_v31 = vand.u32 2147483647, %v3948_v12  ;;  %vm290_vm15 = vcmp.lt.s32.totalorder %v3935_v5, 0 }
  0x26   : > { %v292_v13 = vshrl.u32 %v291_v8, 23  ;;  %v295_v15 = vand.u32 8388607, %v288_v7  ;;  %v395_v16 = vshrl.u32 %v394_v11, 23  ;;  %v398_v17 = vand.u32 8388607, %v391_v10 }
  0x27   : > { %v498_v22 = vshrl.u32 %v497_v19, 23  ;;  %vm4043_vm14 = vcmp.le.f32.partialorder %v288_v7, 0.7853982 }
  0x28   : > { %v3256_v18 = vadd.s32 4294967169, %v292_v13  ;;  %v3260_v20 = vadd.s32 4294967169, %v395_v16  ;;  %v296_v23 = vor.u32 8388608, %v295_v15  ;;  %v399_v24 = vor.u32 8388608, %v398_v17 }
  0x29   : > { %v3264_v26 = vadd.s32 4294967169, %v498_v22 }
  0x2a   : > { %v298_v21 = vadd.s32 1, %v3256_v18  ;;  %v401_v25 = vadd.s32 1, %v3260_v20  ;;  %v3960_v32 = vshll.u32 %v296_v23, 8  ;;  %v3962_v34 = vshll.u32 %v399_v24, 8 }
  0x2b   : > { %v3964_v35 = vadd.s32 1, %v3264_v26 }
  0x2c   : > { %vm299_vm1 = vcmp.gt.s32.totalorder %v298_v21, 0  ;;  %vm402_vm2 = vcmp.gt.s32.totalorder %v401_v25, 0 }
  0x2d   : > { %v300_v27 = vsel %vm299_vm1, %v298_v21, 0  ;;  %v403_v30 = vsel %vm402_vm2, %v401_v25, 0  ;;  %vm505_vm12 = vcmp.gt.s32.totalorder %v3964_v35, 0 }
  0x2e   : > { %v301_v28 = vshrl.u32 %v300_v27, 5  ;;  %v302_v29 = vand.u32 31, %v300_v27  ;;  %v405_v33 = vand.u32 31, %v403_v30  ;;  %v3971_v47 = vshrl.u32 %v403_v30, 5 }
  0x30   : > { %v303_v36 = vsub.s32 32, %v302_v29  ;;  %v305_v38 = vshll.u32 %v3849_v37, %v302_v29  ;;  %v308_v40 = vshll.u32 %v3850_v39, %v302_v29  ;;  %v311_v42 = vshll.u32 %v3851_v41, %v302_v29 }
  0x31   : > { %v314_v44 = vshll.u32 %v3852_v43, %v302_v29  ;;  %v317_v46 = vshll.u32 %v3853_v45, %v302_v29  ;;  %vm320_vm3 = vcmp.lt.s32.totalorder %v301_v28, 1  ;;  %vm321_vm4 = vcmp.lt.s32.totalorder %v301_v28, 2 }
  0x32   : > { %v304_v48 = vshrl.u32 %v3849_v37, %v303_v36  ;;  %v306_v49 = vshrl.u32 %v3850_v39, %v303_v36  ;;  %v309_v50 = vshrl.u32 %v3851_v41, %v303_v36  ;;  %v312_v51 = vshrl.u32 %v3852_v43, %v303_v36 }
  0x33   : > { %v315_v52 = vshrl.u32 %v3853_v45, %v303_v36  ;;  %v318_v54 = vshrl.u32 %v3854_v53, %v303_v36  ;;  %vm323_vm5 = vcmp.lt.s32.totalorder %v301_v28, 4  ;;  %v406_v58 = vsub.s32 32, %v405_v33 }
  0x34   : > { %v307_v55 = vor.u32 %v306_v49, %v305_v38  ;;  %v310_v56 = vor.u32 %v309_v50, %v308_v40  ;;  %v313_v57 = vor.u32 %v312_v51, %v311_v42  ;;  %vm322_vm6 = vcmp.lt.s32.totalorder %v301_v28, 3 }
  0x35   : > { %v316_v59 = vor.u32 %v315_v52, %v314_v44  ;;  %v319_v60 = vor.u32 %v318_v54, %v317_v46  ;;  %v408_v61 = vshll.u32 %v3849_v37, %v405_v33  ;;  %v411_v8 = vshll.u32 %v3850_v39, %v405_v33 }
  0x36   : > { %v324_v62 = vsel %vm320_vm3, %v304_v48, %v307_v55  ;;  %v325_v63 = vsel %vm323_vm5, %v313_v57, 2102212464  ;;  %v328_v0 = vsel %vm320_vm3, %v307_v55, %v310_v56  ;;  %v332_v1 = vsel %vm320_vm3, %v310_v56, %v313_v57 }
  0x37   : > { %v326_v2 = vsel %vm322_vm6, %v310_v56, %v325_v63  ;;  %v329_v3 = vsel %vm323_vm5, %v316_v59, 920167782  ;;  %v333_v4 = vsel %vm323_vm5, %v319_v60, 1326507024  ;;  %v407_v13 = vshrl.u32 %v3849_v37, %v406_v58 }
  0x38   : > { %v330_v9 = vsel %vm322_vm6, %v313_v57, %v329_v3  ;;  %v334_v11 = vsel %vm322_vm6, %v316_v59, %v333_v4  ;;  %v409_v15 = vshrl.u32 %v3850_v39, %v406_v58  ;;  %v327_v16 = vsel %vm321_vm4, %v324_v62, %v326_v2  ;;  %v4030_v2 = vld [vmem:[%s3931_s7 + $0x18] sm:$0xff] }
  0x39   : > { %v331_v17 = vsel %vm321_vm4, %v328_v0, %v330_v9  ;;  %v335_v18 = vsel %vm321_vm4, %v332_v1, %v334_v11  ;;  %v412_v19 = vshrl.u32 %v3851_v41, %v406_v58  ;;  %v414_v26 = vshll.u32 %v3851_v41, %v405_v33 }
  0x3a   : > { %v3991_v20 = vmul.u32.u64.low %v3960_v32, %v335_v18  ;;  %v3992_v21 = vmul.u32.u64.high %v3960_v32, %v335_v18, %v3991_v20  ;;  %v3995_v22 = vmul.u32.u64.low %v3960_v32, %v331_v17  ;;  %v3996_v23 = vmul.u32.u64.high %v3960_v32, %v331_v17, %v3995_v22 }
  0x3b   : > { %v410_v24 = vor.u32 %v409_v15, %v408_v61  ;;  %v413_v25 = vor.u32 %v412_v19, %v411_v8  ;;  %v415_v27 = vshrl.u32 %v3852_v43, %v406_v58  ;;  %v417_v28 = vshll.u32 %v3852_v43, %v405_v33 }
  0x3c   : > { %v418_v29 = vshrl.u32 %v3853_v45, %v406_v58  ;;  %v420_v30 = vshll.u32 %v3853_v45, %v405_v33  ;;  %v421_v36 = vshrl.u32 %v3854_v53, %v406_v58  ;;  %v343_v38 = vmul.u32 %v3960_v32, %v327_v16 }
  0x3d   : > { %v416_v40 = vor.u32 %v415_v27, %v414_v26  ;;  %vm423_vm7 = vcmp.lt.s32.totalorder %v3971_v47, 1  ;;  %vm424_vm8 = vcmp.lt.s32.totalorder %v3971_v47, 2  ;;  %vm345_vm9 = vc.u32 %v3992_v21, %v3995_v22 }
  0x3e   : > { %v346_v42 = vadd.s32 1, %v3996_v23  ;;  %v419_v44 = vor.u32 %v418_v29, %v417_v28  ;;  %vm425_vm10 = vcmp.lt.s32.totalorder %v3971_v47, 3  ;;  %v422_v46 = vor.u32 %v421_v36, %v420_v30 }
  0x3f   : > { %vm426_vm11 = vcmp.lt.s32.totalorder %v3971_v47, 4  ;;  %v427_v33 = vsel %vm423_vm7, %v407_v13, %v410_v24  ;;  %v431_v48 = vsel %vm423_vm7, %v410_v24, %v413_v25  ;;  %v435_v51 = vsel %vm423_vm7, %v413_v25, %v416_v40 }
  0x40   : > { %v347_v32 = vsel %vm345_vm9, %v346_v42, %v3996_v23  ;;  %v428_v49 = vsel %vm426_vm11, %v416_v40, 2102212464  ;;  %v432_v50 = vsel %vm426_vm11, %v419_v44, 920167782  ;;  %v436_v56 = vsel %vm426_vm11, %v422_v46, 1326507024 }
  0x41   : > { %v348_v52 = vadd.s32 %v347_v32, %v343_v38  ;;  %v429_v54 = vsel %vm425_vm10, %v413_v25, %v428_v49  ;;  %v433_v55 = vsel %vm425_vm10, %v416_v40, %v432_v50  ;;  %v437_v59 = vsel %vm425_vm10, %v419_v44, %v436_v56 }
  0x42   : > { %v430_v57 = vsel %vm424_vm8, %v427_v33, %v429_v54  ;;  %v434_v58 = vsel %vm424_vm8, %v431_v48, %v433_v55  ;;  %v438_v61 = vsel %vm424_vm8, %v435_v51, %v437_v59  ;;  %v506_v4 = vsel %vm505_vm12, %v3964_v35, 0 }
  0x43   : > { %v349_v60 = vadd.s32 536870912, %v348_v52  ;;  %v4022_v62 = vmul.u32.u64.low %v3962_v34, %v434_v58  ;;  %v4023_v63 = vmul.u32.u64.high %v3962_v34, %v434_v58, %v4022_v62  ;;  %v446_v8 = vmul.u32 %v3962_v34, %v430_v57 }
  0x44   : > { %v4026_v0 = vmul.u32.u64.low %v3962_v34, %v438_v61  ;;  %v4027_v1 = vmul.u32.u64.high %v3962_v34, %v438_v61, %v4026_v0  ;;  %v501_v9 = vand.u32 8388607, %v494_v31  ;;  %v600_v13 = vand.u32 2139095040, %v4030_v2 }
  0x45   : > { %v350_v3 = vshrl.u32 %v349_v60, 30  ;;  %v449_v11 = vadd.s32 1, %v4023_v63  ;;  %v508_v15 = vand.u32 31, %v506_v4  ;;  %v597_v18 = vand.u32 2147483647, %v4030_v2 }
  0x46   : > { %vm448_vm13 = vc.u32 %v4027_v1, %v4022_v62  ;;  %v502_v35 = vor.u32 8388608, %v501_v9  ;;  %v601_v34 = vshrl.u32 %v600_v13, 23  ;;  %v344_v29 = vadd.s32 %v3995_v22, %v3992_v21 }
  0x47   : > { %v351_v47 = vshll.u32 %v350_v3, 30  ;;  %v450_v17 = vsel %vm448_vm13, %v449_v11, %v4023_v63  ;;  %v374_v23 = vsub.s32 4, %v350_v3  ;;  %v509_v25 = vsub.s32 32, %v508_v15 }
  0x48   : > { %v451_v19 = vadd.s32 %v450_v17, %v446_v8  ;;  %v4050_v28 = vand.u32 8388607, %v597_v18  ;;  %v4056_v36 = vshrl.u32 %v506_v4, 5  ;;  %v4058_v38 = vshll.u32 %v502_v35, 8 }
  0x49   : > { %v352_v16 = vsub.s32 %v348_v52, %v351_v47  ;;  %v511_v40 = vshll.u32 %v3849_v37, %v508_v15  ;;  %v514_v42 = vshll.u32 %v3850_v39, %v508_v15  ;;  %v3268_v44 = vadd.s32 4294967169, %v601_v34 }
  0x4a   : > { %v452_v24 = vadd.s32 536870912, %v451_v19  ;;  %v375_v46 = vsel %vm290_vm15, %v374_v23, %v350_v3  ;;  %v512_v48 = vshrl.u32 %v3850_v39, %v509_v25  ;;  %v515_v21 = vshrl.u32 %v3851_v41, %v509_v25 }
  0x4b   : > { %v354_v20 = vsub.s32 0, %v352_v16  ;;  %v447_v32 = vadd.s32 %v4022_v62, %v4027_v1  ;;  %v517_v49 = vshll.u32 %v3851_v41, %v508_v15  ;;  %v518_v50 = vshrl.u32 %v3852_v43, %v509_v25 }
  0x4c   : > { %v4054_v30 = vshrl.u32 %v452_v24, 30  ;;  %v510_v52 = vshrl.u32 %v3849_v37, %v509_v25  ;;  %v520_v54 = vshll.u32 %v3852_v43, %v508_v15  ;;  %v521_v55 = vshrl.u32 %v3853_v45, %v509_v25 }
  0x4d   : > { %v3257_v27 = vmin.u32 %v354_v20, %v352_v16  ;;  %v377_v56 = vsel %vm4043_vm14, 0, %v375_v46  ;;  %v523_v57 = vshll.u32 %v3853_v45, %v508_v15  ;;  %v524_v58 = vshrl.u32 %v3854_v53, %v509_v25 }
  0x4e   : > { %v454_v33 = vshll.u32 %v4054_v30, 30  ;;  %v513_v61 = vor.u32 %v512_v48, %v511_v40  ;;  %v516_v62 = vor.u32 %v515_v21, %v514_v42  ;;  %v519_v3 = vor.u32 %v518_v50, %v517_v49 }
  0x4f   : > { %v356_v7 = vclz %v3257_v27  ;;  %v522_v8 = vor.u32 %v521_v55, %v520_v54  ;;  %vm526_vm1 = vcmp.lt.s32.totalorder %v4056_v36, 1  ;;  %vm529_vm2 = vcmp.lt.s32.totalorder %v4056_v36, 4 }
  0x50   : > { %v4070_v51 = vsub.s32 %v451_v19, %v454_v33  ;;  %v525_v11 = vor.u32 %v524_v58, %v523_v57  ;;  %v531_v13 = vsel %vm529_vm2, %v519_v3, 2102212464  ;;  %v1205_v15 = vadd.s32 3, %v377_v56 }
  0x51   : > { %v3258_v22 = vadd.s32 4294967294, %v356_v7  ;;  %vm527_vm3 = vcmp.lt.s32.totalorder %v4056_v36, 2  ;;  %vm528_vm4 = vcmp.lt.s32.totalorder %v4056_v36, 3  ;;  %v530_v35 = vsel %vm526_vm1, %v510_v52, %v513_v61 }
  0x52   : > { %v457_v60 = vsub.s32 0, %v4070_v51  ;;  %v534_v20 = vsel %vm526_vm1, %v513_v61, %v516_v62  ;;  %vm393_vm5 = vcmp.lt.s32.totalorder %v3938_v6, 0  ;;  %v532_v23 = vsel %vm528_vm4, %v516_v62, %v531_v13 }
  0x53   : > { %vm3259_vm0 = vcmp.lt.s32.totalorder %v3258_v22, 0  ;;  %v535_v24 = vsel %vm529_vm2, %v522_v8, 920167782  ;;  %v538_v25 = vsel %vm526_vm1, %v516_v62, %v519_v3  ;;  %v539_v40 = vsel %vm529_vm2, %v525_v11, 1326507024 }
  0x54   : > { %v359_v59 = vsel %vm3259_vm0, 0, %v3258_v22  ;;  %v3261_v4 = vmin.u32 %v457_v60, %v4070_v51  ;;  %v536_v7 = vsel %vm528_vm4, %v519_v3, %v535_v24  ;;  %v477_v42 = vsub.s32 4, %v4054_v30 }
  0x55   : > { %v360_v63 = vsub.s32 32, %v359_v59  ;;  %v361_v0 = vshll.u32 %v352_v16, %v359_v59  ;;  %v364_v1 = vsub.s32 4294967266, %v359_v59  ;;  %v537_v46 = vsel %vm527_vm3, %v534_v20, %v536_v7 }
  0x56   : > { %v459_v17 = vclz %v3261_v4  ;;  %v540_v33 = vsel %vm528_vm4, %v522_v8, %v539_v40  ;;  %v607_v49 = vadd.s32 1, %v3268_v44  ;;  %v533_v55 = vsel %vm527_vm3, %v530_v35, %v532_v23 }
  0x57   : > { %v362_v9 = vshrl.u32 %v344_v29, %v360_v63  ;;  %v365_v47 = vadd.s32 127, %v364_v1  ;;  %v541_v22 = vsel %vm527_vm3, %v538_v25, %v540_v33  ;;  %v4124_v1 = vand.u32 3, %v1205_v15 }
  0x58   : > { %v3262_v34 = vadd.s32 4294967294, %v459_v17  ;;  %v4113_v58 = vmul.u32.u64.low %v4058_v38, %v541_v22  ;;  %v4114_v59 = vmul.u32.u64.high %v4058_v38, %v541_v22, %v4113_v58  ;;  %vm608_vm7 = vcmp.gt.s32.totalorder %v607_v49, 0 }
  0x59   : > { %v363_v16 = vor.u32 %v362_v9, %v361_v0  ;;  %v366_v19 = vshll.u32 %v365_v47, 23  ;;  %v4117_v62 = vmul.u32.u64.low %v4058_v38, %v537_v46  ;;  %v4118_v63 = vmul.u32.u64.high %v4058_v38, %v537_v46, %v4117_v62 }
  0x5a   : > { %vm3263_vm6 = vcmp.lt.s32.totalorder %v3262_v34, 0  ;;  %v4121_v0 = vand.u32 3, %v377_v56  ;;  %v609_v36 = vsel %vm608_vm7, %v607_v49, 0  ;;  %vm4128_vm8 = vcmp.le.f32.partialorder %v391_v10, 0.7853982 }
  0x5b   : > { %v367_v27 = vor.u32 4788187, %v366_v19  ;;  %v370_v29 = vcvt.s32.f32 %v363_v16  ;;  %v462_v21 = vsel %vm3263_vm6, 0, %v3262_v34  ;;  %v611_v8 = vand.u32 31, %v609_v36 }
  0x5c   : > { %v463_v50 = vsub.s32 32, %v462_v21  ;;  %v464_v52 = vshll.u32 %v4070_v51, %v462_v21  ;;  %v467_v54 = vsub.s32 4294967266, %v462_v21  ;;  %v605_v51 = vor.u32 8388608, %v4050_v28 }
  0x5d   : > { %v368_v48 = vand.u32 2147483647, %v367_v27  ;;  %v478_v56 = vsel %vm393_vm5, %v477_v42, %v4054_v30  ;;  %v549_v28 = vmul.u32 %v4058_v38, %v533_v55  ;;  %vm551_vm9 = vc.u32 %v4114_v59, %v4117_v62 }
  0x5e   : > { %v465_v60 = vshrl.u32 %v447_v32, %v463_v50  ;;  %v468_v61 = vadd.s32 127, %v467_v54  ;;  %v552_v13 = vadd.s32 1, %v4118_v63  ;;  %v4144_v15 = vshrl.u32 %v609_v36, 5 }
  0x5f   : > { %v371_v57 = vmul.f32 %v370_v29, %v368_v48  ;;  %v612_v17 = vsub.s32 32, %v611_v8  ;;  %v614_v30 = vshll.u32 %v3849_v37, %v611_v8  ;;  %v617_v19 = vshll.u32 %v3850_v39, %v611_v8  ;;  %v4156_v29 = vld [vmem:[%s3931_s7 + $0x20] sm:$0xff] }
  0x60   : > { %v466_v32 = vor.u32 %v465_v60, %v464_v52  ;;  %v469_v4 = vshll.u32 %v468_v61, 23  ;;  %v553_v16 = vsel %vm551_vm9, %v552_v13, %v4118_v63  ;;  %v620_v34 = vshll.u32 %v3851_v41, %v611_v8 }
  0x61   : > { %v372_v44 = vxor.u32 2147483648, %v371_v57  ;;  %v554_v35 = vadd.s32 %v553_v16, %v549_v28  ;;  %v615_v26 = vshrl.u32 %v3850_v39, %v612_v17  ;;  %v618_v20 = vshrl.u32 %v3851_v41, %v612_v17 }
  0x62   : > { %v470_v47 = vor.u32 4788187, %v469_v4  ;;  %v473_v11 = vcvt.s32.f32 %v466_v32  ;;  %v621_v24 = vshrl.u32 %v3852_v43, %v612_v17  ;;  %v623_v25 = vshll.u32 %v3852_v43, %v611_v8 }
  0x63   : > { %v373_v9 = vsel %vm290_vm15, %v372_v44, %v371_v57  ;;  %v624_v27 = vshrl.u32 %v3853_v45, %v612_v17  ;;  %v555_v7 = vadd.s32 536870912, %v554_v35  ;;  %v616_v40 = vor.u32 %v615_v26, %v614_v30 }
  0x64   : > { %v376_v10 = vsel %vm4043_vm14, %v3935_v5, %v373_v9  ;;  %v471_v38 = vand.u32 2147483647, %v470_v47  ;;  %v626_v42 = vshll.u32 %v3853_v45, %v611_v8  ;;  %v700_v46 = vand.u32 2147483647, %v4156_v29 }
  0x65   : > { %3720 = vcosq.f32 %v376_v10  ;;  %vm386_vm10 = vcmp.eq.s32.totalorder %v4121_v0, 2  ;;  %v619_v48 = vor.u32 %v618_v20, %v617_v19  ;;  %v625_v21 = vor.u32 %v624_v27, %v623_v25 }
  0x66   : > { %3722 = vsinq.f32 %v376_v10  ;;  %v474_v23 = vmul.f32 %v473_v11, %v471_v38  ;;  %v627_v22 = vshrl.u32 %v3854_v53, %v612_v17  ;;  %vm1208_vm11 = vcmp.eq.s32.totalorder %v4124_v1, 0 }
  0x67   : > { %vm383_vm12 = vcmp.eq.s32.totalorder %v4121_v0, 0  ;;  %v480_v49 = vsel %vm4128_vm8, 0, %v478_v56  ;;  %v4166_v50 = vshrl.u32 %v555_v7, 30  ;;  %vm629_vm13 = vcmp.lt.s32.totalorder %v4144_v15, 1 }
  0x68   : > { %v475_v33 = vxor.u32 2147483648, %v474_v23  ;;  %vm1207_vm14 = vcmp.lt.s32.totalorder %v4124_v1, 2  ;;  %vm382_vm15 = vcmp.lt.s32.totalorder %v4121_v0, 2  ;;  %v622_v54 = vor.u32 %v621_v24, %v620_v34 }
  0x69   : > { %v628_v55 = vor.u32 %v627_v22, %v626_v42  ;;  %vm632_vm0 = vcmp.lt.s32.totalorder %v4144_v15, 4  ;;  %vm380_vm1 = vweird.f32 %v3935_v5  ;;  %v557_v58 = vshll.u32 %v4166_v50, 30 }
  0x6a   : > { %v476_v52 = vsel %vm393_vm5, %v475_v33, %v474_v23  ;;  %vm631_vm2 = vcmp.lt.s32.totalorder %v4144_v15, 3  ;;  %v4180_v60 = vshll.u32 %v605_v51, 8  ;;  %vm1954_vm3 = vcmask 97280  }
  0x6b   : > { %v479_v57 = vsel %vm4128_vm8, %v3938_v6, %v476_v52  ;;  %vm630_vm4 = vcmp.lt.s32.totalorder %v4144_v15, 2  ;;  %v637_v61 = vsel %vm629_vm13, %v616_v40, %v619_v48  ;;  %v638_v63 = vsel %vm632_vm0, %v625_v21, 920167782 }
  0x6c   : > { %3724 = vcosq.f32 %v479_v57  ;;  %v1309_v44 = vadd.s32 3, %v480_v49  ;;  %v4187_v36 = vsub.s32 %v554_v35, %v557_v58  ;;  %v703_v3 = vand.u32 2139095040, %v4156_v29 }
  0x6d   : > { %3726 = vsinq.f32 %v479_v57  ;;  %v4190_v32 = vand.u32 3, %v480_v49  ;;  %vm496_vm5 = vcmp.lt.s32.totalorder %v3948_v12, 0  ;;  %v613_v51 = vshrl.u32 %v3849_v37, %v612_v17 }
  0x6e   : > { %v639_v4 = vsel %vm631_vm2, %v622_v54, %v638_v63  ;;  %v642_v8 = vsel %vm632_vm0, %v628_v55, 1326507024  ;;  %vm1211_vm6 = vcmp.eq.s32.totalorder %v4124_v1, 2  ;;  %v560_v9 = vsub.s32 0, %v4187_v36 }
  0x6f   : > { %v634_v56 = vsel %vm632_vm0, %v622_v54, 2102212464  ;;  %v640_v28 = vsel %vm630_vm4, %v637_v61, %v639_v4  ;;  %v641_v47 = vsel %vm629_vm13, %v619_v48, %v622_v54  ;;  %v643_v11 = vsel %vm631_vm2, %v625_v21, %v642_v8 }
  0x70   : > { %v4209_v13 = vmul.u32.u64.low %v4180_v60, %v640_v28  ;;  %v4210_v17 = vmul.u32.u64.high %v4180_v60, %v640_v28, %v4209_v13  ;;  %v1310_v16 = vand.u32 3, %v1309_v44  ;;  %vm4215_vm7 = vcmp.le.f32.partialorder %v494_v31, 0.7853982 }
  0x71   : > { %v3265_v35 = vmin.u32 %v560_v9, %v4187_v36  ;;  %v704_v26 = vshrl.u32 %v703_v3, 23  ;;  %vm486_vm8 = vcmp.eq.s32.totalorder %v4190_v32, 0  ;;  %v580_v34 = vsub.s32 4, %v4166_v50 }
  0x72   : > { %v3721_v10 = vpop.eup %3720  ;;  %v633_v23 = vsel %vm629_vm13, %v613_v51, %v616_v40  ;;  %v635_v24 = vsel %vm631_vm2, %v619_v48, %v634_v56  ;;  %vm485_vm9 = vcmp.lt.s32.totalorder %v4190_v32, 2  ;;  %v644_v7 = vsel %vm630_vm4, %v641_v47, %v643_v11 }
  0x73   : > { %v3723_v30 = vpop.eup %3722  ;;  %v387_v38 = vxor.u32 2147483648, %v3721_v10  ;;  %v562_v27 = vclz %v3265_v35  ;;  %vm483_vm13 = vweird.f32 %v3938_v6  ;;  %vm489_vm0 = vcmp.eq.s32.totalorder %v4190_v32, 2 }
  0x74   : > { %v384_v20 = vxor.u32 2147483648, %v3723_v30  ;;  %v550_v33 = vadd.s32 %v4117_v62, %v4114_v59  ;;  %v636_v49 = vsel %vm630_vm4, %v633_v23, %v635_v24  ;;  %v581_v59 = vsel %vm496_vm5, %v580_v34, %v4166_v50  ;;  %v2280_v23 = vld [vmem:[#allocation2 + $0x60] sm:$0xff] }
  0x75   : > { %v1213_v31 = vsel %vm1211_vm6, %v387_v38, %v3723_v30  ;;  %v388_v25 = vsel %vm386_vm10, %v387_v38, %v3723_v30  ;;  %v3266_v22 = vadd.s32 4294967294, %v562_v27  ;;  %v655_v62 = vadd.s32 1, %v4210_v17 }
  0x76   : > { %v1210_v42 = vsel %vm1208_vm11, %v3721_v10, %v384_v20  ;;  %v385_v40 = vsel %vm383_vm12, %v3721_v10, %v384_v20  ;;  %v4252_v55 = vmul.u32.u64.low %v4180_v60, %v644_v7  ;;  %v4253_v57 = vmul.u32.u64.high %v4180_v60, %v644_v7, %v4252_v55  ;;  %v2279_v7 = vld [vmem:[#allocation2 + $0x58] sm:$0xff] }
  0x77   : > { %v1214_v48 = vsel %vm1207_vm14, %v1210_v42, %v1213_v31  ;;  %v389_v21 = vsel %vm382_vm15, %v385_v40, %v388_v25  ;;  %vm3267_vm10 = vcmp.lt.s32.totalorder %v3266_v22, 0  ;;  %v3272_v0 = vadd.s32 4294967169, %v704_v26 }
  0x78   : > { %v1215_v52 = vsel %vm380_vm1, nan, %v1214_v48  ;;  %v390_v54 = vsel %vm380_vm1, nan, %v389_v21  ;;  %vm1311_vm11 = vcmp.lt.s32.totalorder %v1310_v16, 2  ;;  %vm1312_vm12 = vcmp.eq.s32.totalorder %v1310_v16, 0  ;;  %v2278_v48 = vld [vmem:[#allocation2 + $0x50] sm:$0xff] }
  0x79   : > { %3493 = vmatprep.mubr.msk.f32.mxu0 %vm1954_vm3, %v1215_v52  ;;  %3509 = vmatprep.mubr.msk.f32.mxu1 %vm1954_vm3, %v390_v54  ;;  %v565_v5 = vsel %vm3267_vm10, 0, %v3266_v22  ;;  %v652_v1 = vmul.u32 %v4180_v60, %v636_v49  ;;  %v3725_v15 = vpop.eup %3724  ;;  %vm1315_vm14 = vcmp.eq.s32.totalorder %v1310_v16, 2  ;;  %v583_v51 = vsel %vm4215_vm7, 0, %v581_v59 }
  0x7a   : > { %v566_v58 = vsub.s32 32, %v565_v5  ;;  %v567_v61 = vshll.u32 %v4187_v36, %v565_v5  ;;  %v570_v63 = vsub.s32 4294967266, %v565_v5  ;;  %v3727_v44 = vpop.eup %3726  ;;  %v490_v3 = vxor.u32 2147483648, %v3725_v15 }
  0x7b   : > { %vm654_vm15 = vc.u32 %v4253_v57, %v4209_v13  ;;  %v710_v50 = vadd.s32 1, %v3272_v0  ;;  %v487_v4 = vxor.u32 2147483648, %v3727_v44  ;;  %v707_v32 = vand.u32 8388607, %v700_v46  ;;  %v2277_v0 = vld [vmem:[#allocation2 + $0x48] sm:$0xff] }
  0x7c   : > { %v568_v8 = vshrl.u32 %v550_v33, %v566_v58  ;;  %v571_v9 = vadd.s32 127, %v570_v63  ;;  %v656_v60 = vsel %vm654_vm15, %v655_v62, %v4210_v17  ;;  %v1317_v56 = vsel %vm1315_vm14, %v490_v3, %v3727_v44  ;;  %v4297_v62 = vld [vmem:[%s3931_s7 + $0x28] sm:$0xff] }
  0x7d   : > { %v491_v28 = vsel %vm489_vm0, %v490_v3, %v3727_v44  ;;  %v657_v36 = vadd.s32 %v656_v60, %v652_v1  ;;  %vm711_vm1 = vcmp.gt.s32.totalorder %v710_v50, 0  ;;  %v1314_v10 = vsel %vm1312_vm12, %v3725_v15, %v487_v4 }
  0x7e   : > { %v488_v47 = vsel %vm486_vm8, %v3725_v15, %v487_v4  ;;  %v569_v11 = vor.u32 %v568_v8, %v567_v61  ;;  %v572_v30 = vshll.u32 %v571_v9, 23  ;;  %v1318_v38 = vsel %vm1311_vm11, %v1314_v10, %v1317_v56 }
  0x7f   : > { %v492_v35 = vsel %vm485_vm9, %v488_v47, %v491_v28  ;;  %v658_v26 = vadd.s32 536870912, %v657_v36  ;;  %v712_v17 = vsel %vm711_vm1, %v710_v50, 0  ;;  %v1319_v20 = vsel %vm483_vm13, nan, %v1318_v38 }
  0x80   : > { %v493_v34 = vsel %vm483_vm13, nan, %v492_v35  ;;  %v573_v24 = vor.u32 4788187, %v572_v30  ;;  %v576_v31 = vcvt.s32.f32 %v569_v11  ;;  %3494 = vmatmul.mubr.msk.f32.vlgmr.msra.gmra.mxu0 %vm1954_vm3, %v1319_v20  ;;  %v714_v25 = vand.u32 31, %v712_v17 }
  0x81   : > { %3510 = vmatmul.mubr.msk.f32.vlgmr.msra.gmra.mxu1 %vm1954_vm3, %v493_v34  ;;  %v4282_v16 = vshrl.u32 %v658_v26, 30  ;;  %3522 = vmatpush3.msra.mxu0 %v3951_v14  ;;  %v1413_v6 = vadd.s32 3, %v583_v51  ;;  %v4288_v21 = vand.u32 3, %v583_v51  ;;  %v708_v49 = vor.u32 8388608, %v707_v32  ;;  %v2276_v51 = vld [vmem:[#allocation2 + $0x40] sm:$0xff] }
  0x82   : > { %v574_v27 = vand.u32 2147483647, %v573_v24  ;;  %3523 = vmatprep.subr.mxu0 %v2280_v23  ;;  %v715_v40 = vsub.s32 32, %v714_v25  ;;  %v717_v52 = vshll.u32 %v3849_v37, %v714_v25  ;;  %v720_v55 = vshll.u32 %v3850_v39, %v714_v25 }
  0x83   : > { %v660_v42 = vshll.u32 %v4282_v16, 30  ;;  %3524 = vmatpush3.msra.mxu0 %v2280_v23  ;;  %v4299_v5 = vand.u32 3, %v1413_v6  ;;  %v713_v15 = vshrl.u32 %v712_v17, 5  ;;  %v726_v58 = vshll.u32 %v3852_v43, %v714_v25 }
  0x84   : > { %v577_v33 = vmul.f32 %v576_v31, %v574_v27  ;;  %3525 = vmatprep.subr.mxu0 %v2279_v7  ;;  %v718_v54 = vshrl.u32 %v3850_v39, %v715_v40  ;;  %v721_v59 = vshrl.u32 %v3851_v41, %v715_v40  ;;  %v723_v63 = vshll.u32 %v3851_v41, %v714_v25 }
  0x85   : > { %v4290_v22 = vsub.s32 %v657_v36, %v660_v42  ;;  %3526 = vmatpush3.msra.mxu0 %v2279_v7  ;;  %v724_v44 = vshrl.u32 %v3852_v43, %v715_v40  ;;  %v727_v3 = vshrl.u32 %v3853_v45, %v715_v40  ;;  %v653_v4 = vadd.s32 %v4209_v13, %v4253_v57 }
  0x86   : > { %v578_v14 = vxor.u32 2147483648, %v577_v33  ;;  %3527 = vmatprep.subr.mxu0 %v2278_v48  ;;  %v806_v9 = vand.u32 2139095040, %v4297_v62  ;;  %v719_v60 = vor.u32 %v718_v54, %v717_v52  ;;  %v722_v56 = vor.u32 %v721_v59, %v720_v55 }
  0x87   : > { %v663_v1 = vsub.s32 0, %v4290_v22  ;;  %3528 = vmatpush3.msra.mxu0 %v2278_v48  ;;  %v4315_v28 = vshll.u32 %v708_v49, 8  ;;  %v716_v10 = vshrl.u32 %v3849_v37, %v715_v40  ;;  %v728_v19 = vor.u32 %v727_v3, %v726_v58 }
  0x88   : > { %v579_v61 = vsel %vm496_vm5, %v578_v14, %v577_v33  ;;  %3529 = vmatprep.subr.mxu0 %v2277_v0  ;;  %v725_v47 = vor.u32 %v724_v44, %v723_v63  ;;  %v729_v13 = vshll.u32 %v3853_v45, %v714_v25  ;;  %v730_v57 = vshrl.u32 %v3854_v53, %v715_v40 }
  0x89   : > { %v582_v50 = vsel %vm4215_vm7, %v3948_v12, %v579_v61  ;;  %v3269_v8 = vmin.u32 %v663_v1, %v4290_v22  ;;  %3530 = vmatpush3.msra.mxu0 %v2277_v0  ;;  %vm732_vm2 = vcmp.lt.s32.totalorder %v713_v15, 1  ;;  %vm734_vm4 = vcmp.lt.s32.totalorder %v713_v15, 3 }
  0x8a   : > { %3728 = vcosq.f32 %v582_v50  ;;  %3531 = vmatprep.subr.mxu0 %v2276_v51  ;;  %vm735_vm5 = vcmp.lt.s32.totalorder %v713_v15, 4  ;;  %v807_v30 = vshrl.u32 %v806_v9, 23  ;;  %v731_v38 = vor.u32 %v730_v57, %v729_v13 }
  0x8b   : > { %3730 = vsinq.f32 %v582_v50  ;;  %v665_v36 = vclz %v3269_v8  ;;  %3532 = vmatpush3.msra.mxu0 %v2276_v51  ;;  %vm733_vm6 = vcmp.lt.s32.totalorder %v713_v15, 2  ;;  %v737_v35 = vsel %vm735_vm5, %v725_v47, 2102212464 }
  0x8c   : > { %v740_v26 = vsel %vm732_vm2, %v719_v60, %v722_v56  ;;  %vm599_vm7 = vcmp.lt.s32.totalorder %v4030_v2, 0  ;;  %v736_v17 = vsel %vm732_vm2, %v716_v10, %v719_v60  ;;  %v738_v20 = vsel %vm734_vm4, %v722_v56, %v737_v35 }
  0x8d   : > { %v3270_v11 = vadd.s32 4294967294, %v665_v36  ;;  %v741_v34 = vsel %vm735_vm5, %v728_v19, 920167782  ;;  %v744_v31 = vsel %vm732_vm2, %v722_v56, %v725_v47  ;;  %v745_v32 = vsel %vm735_vm5, %v731_v38, 1326507024 }
  0x8e   : > { %v742_v24 = vsel %vm734_vm4, %v725_v47, %v741_v34  ;;  %vm586_vm9 = vweird.f32 %v3948_v12  ;;  %vm4331_vm13 = vcmp.le.f32.partialorder %v597_v18, 0.7853982  ;;  %v739_v40 = vsel %vm733_vm6, %v736_v17, %v738_v20 }
  0x8f   : > { %vm3271_vm8 = vcmp.lt.s32.totalorder %v3270_v11, 0  ;;  %v743_v6 = vsel %vm733_vm6, %v740_v26, %v742_v24  ;;  %v746_v33 = vsel %vm734_vm4, %v728_v19, %v745_v32  ;;  %v3276_v54 = vadd.s32 4294967169, %v807_v30 }
  0x90   : > { %v668_v23 = vsel %vm3271_vm8, 0, %v3270_v11  ;;  %v4338_v48 = vmul.u32.u64.low %v4315_v28, %v743_v6  ;;  %v4339_v49 = vmul.u32.u64.high %v4315_v28, %v743_v6, %v4338_v48  ;;  %v747_v14 = vsel %vm733_vm6, %v744_v31, %v746_v33 }
  0x91   : > { %v669_v25 = vsub.s32 32, %v668_v23  ;;  %v670_v27 = vshll.u32 %v4290_v22, %v668_v23  ;;  %v673_v7 = vsub.s32 4294967266, %v668_v23  ;;  %vm588_vm0 = vcmp.lt.s32.totalorder %v4288_v21, 2 }
  0x92   : > { %v683_v18 = vsub.s32 4, %v4282_v16  ;;  %v4346_v55 = vmul.u32.u64.low %v4315_v28, %v747_v14  ;;  %v4347_v59 = vmul.u32.u64.high %v4315_v28, %v747_v14, %v4346_v55  ;;  %vm589_vm10 = vcmp.eq.s32.totalorder %v4288_v21, 0 }
  0x93   : > { %v671_v22 = vshrl.u32 %v653_v4, %v669_v25  ;;  %v674_v52 = vadd.s32 127, %v673_v7  ;;  %v813_v58 = vadd.s32 1, %v3276_v54  ;;  %vm1416_vm11 = vcmp.eq.s32.totalorder %v4299_v5, 0 }
  0x94   : > { %vm592_vm12 = vcmp.eq.s32.totalorder %v4288_v21, 2  ;;  %v755_v15 = vmul.u32 %v4315_v28, %v739_v40  ;;  %v758_v61 = vadd.s32 1, %v4339_v49  ;;  %vm1419_vm14 = vcmp.eq.s32.totalorder %v4299_v5, 2 }
  0x95   : > { %v672_v0 = vor.u32 %v671_v22, %v670_v27  ;;  %v675_v1 = vshll.u32 %v674_v52, 23  ;;  %vm814_vm15 = vcmp.gt.s32.totalorder %v813_v58, 0  ;;  %v684_v4 = vsel %vm599_vm7, %v683_v18, %v4282_v16  ;;  %v2274_v52 = vld [vmem:[#allocation2 + $0x30] sm:$0xff] }
  0x96   : > { %vm757_vm1 = vc.u32 %v4347_v59, %v4338_v48  ;;  %v815_v8 = vsel %vm814_vm15, %v813_v58, 0  ;;  %vm1415_vm2 = vcmp.lt.s32.totalorder %v4299_v5, 2  ;;  %v686_v57 = vsel %vm4331_vm13, 0, %v684_v4 }
  0x97   : > { %v3729_v63 = vpop.eup %3728  ;;  %v676_v44 = vor.u32 4788187, %v675_v1  ;;  %v679_v3 = vcvt.s32.f32 %v672_v0  ;;  %v759_v56 = vsel %vm757_vm1, %v758_v61, %v4339_v49  ;;  %v817_v19 = vand.u32 31, %v815_v8  ;;  %v2275_v49 = vld [vmem:[#allocation2 + $0x38] sm:$0xff]  ;;  %v4409_v61 = vld [vmem:[%s3931_s7 + $0x30] sm:$0xff] }
  0x98   : > { %v3731_v51 = vpop.eup %3730  ;;  %v593_v50 = vxor.u32 2147483648, %v3729_v63  ;;  %v760_v10 = vadd.s32 %v759_v56, %v755_v15  ;;  %v1517_v20 = vadd.s32 3, %v686_v57  ;;  %v803_v23 = vand.u32 2147483647, %v4297_v62  ;;  %3533 = vmatprep.subr.mxu0 %v2275_v49 }
  0x99   : > { %v590_v9 = vxor.u32 2147483648, %v3731_v51  ;;  %v677_v60 = vand.u32 2147483647, %v676_v44  ;;  %v818_v35 = vsub.s32 32, %v817_v19  ;;  %v4383_v24 = vshrl.u32 %v815_v8, 5  ;;  %3534 = vmatpush3.msra.mxu0 %v2275_v49 }
  0x9a   : > { %v1421_v28 = vsel %vm1419_vm14, %v593_v50, %v3731_v51  ;;  %v594_v36 = vsel %vm592_vm12, %v593_v50, %v3731_v51  ;;  %v761_v38 = vadd.s32 536870912, %v760_v10  ;;  %v820_v31 = vshll.u32 %v3849_v37, %v817_v19  ;;  %3535 = vmatprep.subr.mxu0 %v2274_v52 }
  0x9b   : > { %v1418_v47 = vsel %vm1416_vm11, %v3729_v63, %v590_v9  ;;  %v591_v16 = vsel %vm589_vm10, %v3729_v63, %v590_v9  ;;  %v680_v13 = vmul.f32 %v679_v3, %v677_v60  ;;  %v821_v12 = vshrl.u32 %v3850_v39, %v818_v35  ;;  %3536 = vmatpush3.msra.mxu0 %v2274_v52 }
  0x9c   : > { %v1422_v11 = vsel %vm1415_vm2, %v1418_v47, %v1421_v28  ;;  %v595_v30 = vsel %vm588_vm0, %v591_v16, %v594_v36  ;;  %v4378_v34 = vshrl.u32 %v761_v38, 30  ;;  %v823_v27 = vshll.u32 %v3850_v39, %v817_v19 }
  0x9d   : > { %v1423_v26 = vsel %vm586_vm9, nan, %v1422_v11  ;;  %v596_v5 = vsel %vm586_vm9, nan, %v595_v30  ;;  %v681_v17 = vxor.u32 2147483648, %v680_v13  ;;  %v824_v7 = vshrl.u32 %v3851_v41, %v818_v35 }
  0x9e   : > { %3496 = vmatprep.mubr.msk.f32.mxu0 %vm1954_vm3, %v1423_v26  ;;  %3512 = vmatprep.mubr.msk.f32.mxu1 %vm1954_vm3, %v596_v5  ;;  %v763_v25 = vshll.u32 %v4378_v34, 30  ;;  %v826_v6 = vshll.u32 %v3851_v41, %v817_v19  ;;  %v827_v40 = vshrl.u32 %v3852_v43, %v818_v35  ;;  %v829_v33 = vshll.u32 %v3852_v43, %v817_v19 }
  0x9f   : > { %v682_v21 = vsel %vm599_vm7, %v681_v17, %v680_v13  ;;  %v830_v42 = vshrl.u32 %v3853_v45, %v818_v35  ;;  %v4399_v14 = vand.u32 3, %v686_v57  ;;  %v810_v54 = vand.u32 8388607, %v803_v23 }
  0xa0   : > { %v685_v32 = vsel %vm4331_vm13, %v4030_v2, %v682_v21  ;;  %v4396_v22 = vsub.s32 %v760_v10, %v763_v25  ;;  %v832_v18 = vshll.u32 %v3853_v45, %v817_v19  ;;  %v833_v55 = vshrl.u32 %v3854_v53, %v818_v35 }
  0xa1   : > { %3732 = vcosq.f32 %v685_v32  ;;  %v4405_v0 = vand.u32 3, %v1517_v20  ;;  %v822_v58 = vor.u32 %v821_v12, %v820_v31  ;;  %v831_v15 = vor.u32 %v830_v42, %v829_v33 }
  0xa2   : > { %3734 = vsinq.f32 %v685_v32  ;;  %v766_v1 = vsub.s32 0, %v4396_v22  ;;  %v825_v63 = vor.u32 %v824_v7, %v823_v27  ;;  %v828_v44 = vor.u32 %v827_v40, %v826_v6 }
  0xa3   : > { %v834_v3 = vor.u32 %v833_v55, %v832_v18  ;;  %vm838_vm4 = vcmp.lt.s32.totalorder %v4383_v24, 4  ;;  %v819_v50 = vshrl.u32 %v3849_v37, %v818_v35  ;;  %vm835_vm5 = vcmp.lt.s32.totalorder %v4383_v24, 1 }
  0xa4   : > { %v3273_v51 = vmin.u32 %v766_v1, %v4396_v22  ;;  %vm837_vm6 = vcmp.lt.s32.totalorder %v4383_v24, 3  ;;  %vm692_vm7 = vcmp.eq.s32.totalorder %v4399_v14, 0  ;;  %v811_v4 = vor.u32 8388608, %v810_v54 }
  0xa5   : > { %v840_v8 = vsel %vm838_vm4, %v828_v44, 2102212464  ;;  %v844_v9 = vsel %vm838_vm4, %v831_v15, 920167782  ;;  %v909_v60 = vand.u32 2139095040, %v4409_v61  ;;  %vm1519_vm8 = vcmp.lt.s32.totalorder %v4405_v0, 2 }
  0xa6   : > { %vm691_vm9 = vcmp.lt.s32.totalorder %v4399_v14, 2  ;;  %vm695_vm13 = vcmp.eq.s32.totalorder %v4399_v14, 2  ;;  %v768_v56 = vclz %v3273_v51  ;;  %vm836_vm0 = vcmp.lt.s32.totalorder %v4383_v24, 2 }
  0xa7   : > { %vm689_vm10 = vweird.f32 %v4030_v2  ;;  %v843_v28 = vsel %vm835_vm5, %v822_v58, %v825_v63  ;;  %v845_v36 = vsel %vm837_vm6, %v828_v44, %v844_v9  ;;  %v847_v10 = vsel %vm835_vm5, %v825_v63, %v828_v44 }
  0xa8   : > { %v848_v19 = vsel %vm838_vm4, %v834_v3, 1326507024  ;;  %v3274_v47 = vadd.s32 4294967294, %v768_v56  ;;  %v839_v16 = vsel %vm835_vm5, %v819_v50, %v822_v58  ;;  %v841_v13 = vsel %vm837_vm6, %v825_v63, %v840_v8 }
  0xa9   : > { %v849_v57 = vsel %vm837_vm6, %v831_v15, %v848_v19  ;;  %vm1520_vm11 = vcmp.eq.s32.totalorder %v4405_v0, 0  ;;  %v851_v30 = vshll.u32 %v811_v4, 8  ;;  %v910_v38 = vshrl.u32 %v909_v60, 23 }
  0xaa   : > { %v850_v11 = vsel %vm836_vm0, %v847_v10, %v849_v57  ;;  %vm1523_vm12 = vcmp.eq.s32.totalorder %v4405_v0, 2  ;;  %v756_v35 = vadd.s32 %v4338_v48, %v4347_v59  ;;  %vm3275_vm14 = vcmp.lt.s32.totalorder %v3274_v47, 0 }
  0xab   : > { %v846_v26 = vsel %vm836_vm0, %v843_v28, %v845_v36  ;;  %v771_v5 = vsel %vm3275_vm14, 0, %v3274_v47  ;;  %v842_v17 = vsel %vm836_vm0, %v839_v16, %v841_v13  ;;  %v3280_v27 = vadd.s32 4294967169, %v910_v38  ;;  %v4491_v28 = vld [vmem:[%s3931_s7 + $0x38] sm:$0xff] }
  0xac   : > { %v4451_v20 = vmul.u32.u64.low %v851_v30, %v850_v11  ;;  %v4452_v21 = vmul.u32.u64.high %v851_v30, %v850_v11, %v4451_v20  ;;  %v772_v12 = vsub.s32 32, %v771_v5  ;;  %v773_v32 = vshll.u32 %v4396_v22, %v771_v5 }
  0xad   : > { %v776_v25 = vsub.s32 4294967266, %v771_v5  ;;  %v786_v48 = vsub.s32 4, %v4378_v34  ;;  %v4456_v59 = vmul.u32.u64.low %v851_v30, %v846_v26  ;;  %v4457_v40 = vmul.u32.u64.high %v851_v30, %v846_v26, %v4456_v59 }
  0xae   : > { %v3733_v31 = vpop.eup %3732  ;;  %v774_v24 = vshrl.u32 %v756_v35, %v772_v12  ;;  %v916_v42 = vadd.s32 1, %v3280_v27  ;;  %v858_v54 = vmul.u32 %v851_v30, %v842_v17  ;;  %vm702_vm2 = vcmp.lt.s32.totalorder %v4156_v29, 0 }
  0xaf   : > { %v3735_v7 = vpop.eup %3734  ;;  %v696_v6 = vxor.u32 2147483648, %v3733_v31  ;;  %v777_v49 = vadd.s32 127, %v776_v25  ;;  %vm860_vm15 = vc.u32 %v4452_v21, %v4456_v59  ;;  %v861_v44 = vadd.s32 1, %v4457_v40 }
  0xb0   : > { %v693_v33 = vxor.u32 2147483648, %v3735_v7  ;;  %v775_v1 = vor.u32 %v774_v24, %v773_v32  ;;  %vm917_vm1 = vcmp.gt.s32.totalorder %v916_v42, 0  ;;  %v906_v0 = vand.u32 2147483647, %v4409_v61 }
  0xb1   : > { %v1525_v52 = vsel %vm1523_vm12, %v696_v6, %v3735_v7  ;;  %v697_v22 = vsel %vm695_vm13, %v696_v6, %v3735_v7  ;;  %v778_v58 = vshll.u32 %v777_v49, 23  ;;  %v862_v14 = vsel %vm860_vm15, %v861_v44, %v4457_v40 }
  0xb2   : > { %v1522_v18 = vsel %vm1520_vm11, %v3733_v31, %v693_v33  ;;  %v694_v55 = vsel %vm692_vm7, %v3733_v31, %v693_v33  ;;  %v782_v4 = vcvt.s32.f32 %v775_v1  ;;  %v918_v8 = vsel %vm917_vm1, %v916_v42, 0 }
  0xb3   : > { %v1526_v15 = vsel %vm1519_vm8, %v1522_v18, %v1525_v52  ;;  %v698_v63 = vsel %vm691_vm9, %v694_v55, %v697_v22  ;;  %v779_v50 = vor.u32 4788187, %v778_v58  ;;  %v787_v2 = vsel %vm702_vm2, %v786_v48, %v4378_v34 }
  0xb4   : > { %v1527_v3 = vsel %vm689_vm10, nan, %v1526_v15  ;;  %v699_v51 = vsel %vm689_vm10, nan, %v698_v63  ;;  %v863_v60 = vadd.s32 %v862_v14, %v858_v54  ;;  %v920_v56 = vand.u32 31, %v918_v8 }
  0xb5   : > { %3497 = vmatmul.mubr.msk.f32.gmra.mxu0 %vm1954_vm3, %v1527_v3  ;;  %3513 = vmatmul.mubr.msk.f32.gmra.mxu1 %vm1954_vm3, %v699_v51  ;;  %v780_v9 = vand.u32 2147483647, %v779_v50  ;;  %vm4495_vm4 = vcmp.le.f32.partialorder %v700_v46, 0.7853982  ;;  %v913_v13 = vand.u32 8388607, %v906_v0  ;;  %v859_v14 = vadd.s32 %v4456_v59, %v4452_v21 }
  0xb6   : > { %v864_v19 = vadd.s32 536870912, %v863_v60  ;;  %v921_v47 = vsub.s32 32, %v920_v56  ;;  %v789_v16 = vsel %vm4495_vm4, 0, %v787_v2  ;;  %v4503_v34 = vshrl.u32 %v918_v8, 5 }
  0xb7   : > { %v783_v10 = vmul.f32 %v782_v4, %v780_v9  ;;  %v1012_v57 = vand.u32 2139095040, %v4491_v28  ;;  %v923_v46 = vshll.u32 %v3849_v37, %v920_v56  ;;  %v926_v38 = vshll.u32 %v3850_v39, %v920_v56 }
  0xb8   : > { %v4506_v30 = vshrl.u32 %v864_v19, 30  ;;  %v924_v35 = vshrl.u32 %v3850_v39, %v921_v47  ;;  %v927_v26 = vshrl.u32 %v3851_v41, %v921_v47  ;;  %v932_v5 = vshll.u32 %v3852_v43, %v920_v56 }
  0xb9   : > { %v784_v11 = vxor.u32 2147483648, %v783_v10  ;;  %v933_v17 = vshrl.u32 %v3853_v45, %v921_v47  ;;  %v929_v12 = vshll.u32 %v3851_v41, %v920_v56  ;;  %v930_v32 = vshrl.u32 %v3852_v43, %v921_v47 }
  0xba   : > { %v866_v31 = vshll.u32 %v4506_v30, 30  ;;  %v1621_v27 = vadd.s32 3, %v789_v16  ;;  %v935_v7 = vshll.u32 %v3853_v45, %v920_v56  ;;  %v936_v6 = vshrl.u32 %v3854_v53, %v921_v47 }
  0xbb   : > { %v785_v20 = vsel %vm702_vm2, %v784_v11, %v783_v10  ;;  %v4524_v48 = vand.u32 3, %v789_v16  ;;  %v914_v33 = vor.u32 8388608, %v913_v13  ;;  %v925_v24 = vor.u32 %v924_v35, %v923_v46 }
  0xbc   : > { %v788_v25 = vsel %vm4495_vm4, %v4156_v29, %v785_v20  ;;  %v4526_v40 = vsub.s32 %v863_v60, %v866_v31  ;;  %v928_v49 = vor.u32 %v927_v26, %v926_v38  ;;  %v934_v42 = vor.u32 %v933_v17, %v932_v5 }
  0xbd   : > { %3736 = vcosq.f32 %v788_v25  ;;  %v931_v22 = vor.u32 %v930_v32, %v929_v12  ;;  %vm938_vm5 = vcmp.lt.s32.totalorder %v4503_v34, 1  ;;  %v1013_v54 = vshrl.u32 %v1012_v57, 23 }
  0xbe   : > { %3738 = vsinq.f32 %v788_v25  ;;  %v869_v52 = vsub.s32 0, %v4526_v40  ;;  %v922_v18 = vshrl.u32 %v3849_v37, %v921_v47  ;;  %v937_v55 = vor.u32 %v936_v6, %v935_v7 }
  0xbf   : > { %vm941_vm6 = vcmp.lt.s32.totalorder %v4503_v34, 4  ;;  %v4532_v1 = vand.u32 3, %v1621_v27  ;;  %vm940_vm7 = vcmp.lt.s32.totalorder %v4503_v34, 3  ;;  %v4536_v15 = vshll.u32 %v914_v33, 8 }
  0xc0   : > { %v3277_v58 = vmin.u32 %v869_v52, %v4526_v40  ;;  %vm805_vm8 = vcmp.lt.s32.totalorder %v4297_v62, 0  ;;  %vm939_vm9 = vcmp.lt.s32.totalorder %v4503_v34, 2  ;;  %v943_v63 = vsel %vm941_vm6, %v931_v22, 2102212464 }
  0xc1   : > { %v946_v44 = vsel %vm938_vm5, %v925_v24, %v928_v49  ;;  %v947_v3 = vsel %vm941_vm6, %v934_v42, 920167782  ;;  %vm795_vm13 = vcmp.eq.s32.totalorder %v4524_v48, 0  ;;  %vm798_vm0 = vcmp.eq.s32.totalorder %v4524_v48, 2 }
  0xc2   : > { %v871_v51 = vclz %v3277_v58  ;;  %v950_v50 = vsel %vm938_vm5, %v928_v49, %v931_v22  ;;  %v3284_v4 = vadd.s32 4294967169, %v1013_v54  ;;  %vm794_vm10 = vcmp.lt.s32.totalorder %v4524_v48, 2 }
  0xc3   : > { %v942_v8 = vsel %vm938_vm5, %v922_v18, %v925_v24  ;;  %v948_v9 = vsel %vm940_vm7, %v931_v22, %v947_v3  ;;  %v951_v2 = vsel %vm941_vm6, %v937_v55, 1326507024  ;;  %vm792_vm11 = vweird.f32 %v4156_v29 }
  0xc4   : > { %v3278_v60 = vadd.s32 4294967294, %v871_v51  ;;  %v944_v56 = vsel %vm940_vm7, %v928_v49, %v943_v63  ;;  %v949_v21 = vsel %vm939_vm9, %v946_v44, %v948_v9  ;;  %v952_v59 = vsel %vm940_vm7, %v934_v42, %v951_v2  ;;  %v4639_v9 = vld [vmem:[%s4615_s11] sm:$0xff] }
  0xc5   : > { %v889_v36 = vsub.s32 4, %v4506_v30  ;;  %v953_v10 = vsel %vm939_vm9, %v950_v50, %v952_v59  ;;  %v4571_v19 = vmul.u32.u64.low %v4536_v15, %v949_v21  ;;  %v4572_v47 = vmul.u32.u64.high %v4536_v15, %v949_v21, %v4571_v19 }
  0xc6   : > { %vm3279_vm12 = vcmp.lt.s32.totalorder %v3278_v60, 0  ;;  %v4576_v16 = vmul.u32.u64.low %v4536_v15, %v953_v10  ;;  %v4577_v13 = vmul.u32.u64.high %v4536_v15, %v953_v10, %v4576_v16  ;;  %v1019_v57 = vadd.s32 1, %v3284_v4 }
  0xc7   : > { %vm1623_vm14 = vcmp.lt.s32.totalorder %v4532_v1, 2  ;;  %vm1624_vm15 = vcmp.eq.s32.totalorder %v4532_v1, 0  ;;  %v874_v11 = vsel %vm3279_vm12, 0, %v3278_v60  ;;  %v945_v46 = vsel %vm939_vm9, %v942_v8, %v944_v56 }
  0xc8   : > { %v875_v38 = vsub.s32 32, %v874_v11  ;;  %v876_v35 = vshll.u32 %v4526_v40, %v874_v11  ;;  %v879_v26 = vsub.s32 4294967266, %v874_v11  ;;  %vm1020_vm1 = vcmp.gt.s32.totalorder %v1019_v57, 0 }
  0xc9   : > { %vm1627_vm2 = vcmp.eq.s32.totalorder %v4532_v1, 2  ;;  %v964_v17 = vadd.s32 1, %v4572_v47  ;;  %v1009_v20 = vand.u32 2147483647, %v4491_v28  ;;  %v1021_v31 = vsel %vm1020_vm1, %v1019_v57, 0 }
  0xca   : > { %v3737_v5 = vpop.eup %3736  ;;  %v877_v32 = vshrl.u32 %v859_v14, %v875_v38  ;;  %v880_v25 = vadd.s32 127, %v879_v26  ;;  %v890_v27 = vsel %vm805_vm8, %v889_v36, %v4506_v30  ;;  %v961_v6 = vmul.u32 %v4536_v15, %v945_v46 }
  0xcb   : > { %v3739_v12 = vpop.eup %3738  ;;  %v799_v34 = vxor.u32 2147483648, %v3737_v5  ;;  %vm963_vm4 = vc.u32 %v4577_v13, %v4571_v19  ;;  %v1023_v40 = vand.u32 31, %v1021_v31  ;;  %vm4623_vm5 = vcmp.le.f32.partialorder %v803_v23, 0.7853982 }
  0xcc   : > { %v796_v7 = vxor.u32 2147483648, %v3739_v12  ;;  %v878_v49 = vor.u32 %v877_v32, %v876_v35  ;;  %v881_v42 = vshll.u32 %v880_v25, 23  ;;  %v965_v22 = vsel %vm963_vm4, %v964_v17, %v4572_v47 }
  0xcd   : > { %v1629_v33 = vsel %vm1627_vm2, %v799_v34, %v3739_v12  ;;  %v800_v24 = vsel %vm798_vm0, %v799_v34, %v3739_v12  ;;  %v1024_v54 = vsub.s32 32, %v1023_v40  ;;  %v966_v1 = vadd.s32 %v965_v22, %v961_v6  ;;  %v4664_v12 = vld [vmem:[%s4615_s11 + $0x8] sm:$0xff] }
  0xce   : > { %v1626_v52 = vsel %vm1624_vm15, %v3737_v5, %v796_v7  ;;  %v797_v30 = vsel %vm795_vm13, %v3737_v5, %v796_v7  ;;  %v882_v58 = vor.u32 4788187, %v881_v42  ;;  %v885_v15 = vcvt.s32.f32 %v878_v49  ;;  %v4676_v7 = vld [vmem:[%s4615_s11 + $0x18] sm:$0xff] }
  0xcf   : > { %v1630_v18 = vsel %vm1623_vm14, %v1626_v52, %v1629_v33  ;;  %v801_v55 = vsel %vm794_vm10, %v797_v30, %v800_v24  ;;  %v892_v51 = vsel %vm4623_vm5, 0, %v890_v27  ;;  %v1016_v50 = vand.u32 8388607, %v1009_v20  ;;  %v4673_v27 = vld [vmem:[%s4615_s11 + $0x10] sm:$0xff] }
  0xd0   : > { %v1631_v63 = vsel %vm792_vm11, nan, %v1630_v18  ;;  %v802_v44 = vsel %vm792_vm11, nan, %v801_v55  ;;  %v883_v3 = vand.u32 2147483647, %v882_v58  ;;  %v4633_v29 = vshrl.u32 %v1021_v31, 5 }
  0xd1   : > { %3499 = vmatprep.mubr.msk.f32.mxu0 %vm1954_vm3, %v1631_v63  ;;  %3515 = vmatprep.mubr.msk.f32.mxu1 %vm1954_vm3, %v802_v44  ;;  %v967_v4 = vadd.s32 536870912, %v966_v1  ;;  %v1026_v23 = vshll.u32 %v3849_v37, %v1023_v40  ;;  %v1027_v14 = vshrl.u32 %v3850_v39, %v1024_v54  ;;  %v1029_v8 = vshll.u32 %v3850_v39, %v1023_v40 }
  0xd2   : > { %v886_v2 = vmul.f32 %v885_v15, %v883_v3  ;;  %v1030_v60 = vshrl.u32 %v3851_v41, %v1024_v54  ;;  %v1035_v56 = vshll.u32 %v3852_v43, %v1023_v40  ;;  %v1036_v21 = vshrl.u32 %v3853_v45, %v1024_v54 }
  0xd3   : > { %v4644_v59 = vshrl.u32 %v967_v4, 30  ;;  %v1032_v36 = vshll.u32 %v3851_v41, %v1023_v40  ;;  %v1033_v10 = vshrl.u32 %v3852_v43, %v1024_v54  ;;  %v1038_v47 = vshll.u32 %v3853_v45, %v1023_v40 }
  0xd4   : > { %v887_v16 = vxor.u32 2147483648, %v886_v2  ;;  %v1017_v39 = vor.u32 8388608, %v1016_v50  ;;  %v1039_v57 = vshrl.u32 %v3854_v53, %v1024_v54  ;;  %v2243_v11 = vmul.f32 %v4639_v9, %v4639_v9 }
  0xd5   : > { %v1725_v46 = vadd.s32 3, %v892_v51  ;;  %v4652_v38 = vand.u32 3, %v892_v51  ;;  %v969_v35 = vshll.u32 %v4644_v59, 30  ;;  %v1028_v26 = vor.u32 %v1027_v14, %v1026_v23 }
  0xd6   : > { %v888_v41 = vsel %vm805_vm8, %v887_v16, %v886_v2  ;;  %v1031_v43 = vor.u32 %v1030_v60, %v1029_v8  ;;  %v1037_v45 = vor.u32 %v1036_v21, %v1035_v56  ;;  %v1040_v5 = vor.u32 %v1039_v57, %v1038_v47 }
  0xd7   : > { %v891_v53 = vsel %vm4623_vm5, %v4297_v62, %v888_v41  ;;  %v4660_v17 = vsub.s32 %v966_v1, %v969_v35  ;;  %v1034_v31 = vor.u32 %v1033_v10, %v1032_v36  ;;  %vm1044_vm6 = vcmp.lt.s32.totalorder %v4633_v29, 4 }
  0xd8   : > { %3740 = vcosq.f32 %v891_v53  ;;  %vm1041_vm7 = vcmp.lt.s32.totalorder %v4633_v29, 1  ;;  %v4667_v34 = vshll.u32 %v1017_v39, 8  ;;  %vm2247_vm8 = vcmask 523264  }
  0xd9   : > { %3742 = vsinq.f32 %v891_v53  ;;  %v972_v32 = vsub.s32 0, %v4660_v17  ;;  %v1025_v25 = vshrl.u32 %v3849_v37, %v1024_v54  ;;  %vm1043_vm9 = vcmp.lt.s32.totalorder %v4633_v29, 3 }
  0xda   : > { %v1046_v6 = vsel %vm1044_vm6, %v1034_v31, 2102212464  ;;  %v1050_v40 = vsel %vm1044_vm6, %v1037_v45, 920167782  ;;  %v1054_v33 = vsel %vm1044_vm6, %v1040_v5, 1326507024  ;;  %v2244_v24 = vmul.f32 %v4664_v12, %v4664_v12 }
  0xdb   : > { %v3281_v49 = vmin.u32 %v972_v32, %v4660_v17  ;;  %vm1042_vm13 = vcmp.lt.s32.totalorder %v4633_v29, 2  ;;  %v1049_v42 = vsel %vm1041_vm7, %v1028_v26, %v1031_v43  ;;  %v1053_v37 = vsel %vm1041_vm7, %v1031_v43, %v1034_v31 }
  0xdc   : > { %v1726_v52 = vand.u32 3, %v1725_v46  ;;  %v1051_v30 = vsel %vm1043_vm9, %v1034_v31, %v1050_v40  ;;  %v1055_v22 = vsel %vm1043_vm9, %v1037_v45, %v1054_v33  ;;  %v2245_v54 = vmul.f32 %v4673_v27, %v4673_v27 }
  0xdd   : > { %v974_v18 = vclz %v3281_v49  ;;  %v1045_v55 = vsel %vm1041_vm7, %v1025_v25, %v1028_v26  ;;  %v1047_v58 = vsel %vm1043_vm9, %v1031_v43, %v1046_v6  ;;  %v2246_v15 = vmul.f32 %v4676_v7, %v4676_v7 }
  0xde   : > { %v1052_v63 = vsel %vm1042_vm13, %v1049_v42, %v1051_v30  ;;  %v1056_v44 = vsel %vm1042_vm13, %v1053_v37, %v1055_v22  ;;  %v2248_v48 = vsel %vm2247_vm8, %v2243_v11, 0.0  ;;  %v2249_v1 = vsel %vm2247_vm8, %v2244_v24, 0.0 }
  0xdf   : > { %v3282_v3 = vadd.s32 4294967294, %v974_v18  ;;  %v4705_v51 = vmul.u32.u64.low %v4667_v34, %v1056_v44  ;;  %v4706_v50 = vmul.u32.u64.high %v4667_v34, %v1056_v44, %v4705_v51  ;;  %v2250_v4 = vadd.f32 %v2249_v1, %v2248_v48 }
  0xe0   : > { %v1048_v23 = vsel %vm1042_vm13, %v1045_v55, %v1047_v58  ;;  %v4711_v14 = vmul.u32.u64.low %v4667_v34, %v1052_v63  ;;  %v4712_v8 = vmul.u32.u64.high %v4667_v34, %v1052_v63, %v4711_v14  ;;  %v2251_v2 = vsel %vm2247_vm8, %v2245_v54, 0.0 }
  0xe1   : > { %v962_v60 = vadd.s32 %v4571_v19, %v4577_v13  ;;  %vm3283_vm0 = vcmp.lt.s32.totalorder %v3282_v3, 0  ;;  %v2252_v56 = vadd.f32 %v2251_v2, %v2250_v4  ;;  %v2253_v21 = vsel %vm2247_vm8, %v2246_v15, 0.0 }
  0xe2   : > { %vm897_vm10 = vcmp.lt.s32.totalorder %v4652_v38, 2  ;;  %vm898_vm11 = vcmp.eq.s32.totalorder %v4652_v38, 0  ;;  %v977_v29 = vsel %vm3283_vm0, 0, %v3282_v3  ;;  %v1064_v16 = vmul.u32 %v4667_v34, %v1048_v23 }
  0xe3   : > { %v978_v36 = vsub.s32 32, %v977_v29  ;;  %v979_v10 = vshll.u32 %v4660_v17, %v977_v29  ;;  %v982_v47 = vsub.s32 4294967266, %v977_v29  ;;  %vm901_vm12 = vcmp.eq.s32.totalorder %v4652_v38, 2 }
  0xe4   : > { %vm1066_vm14 = vc.u32 %v4706_v50, %v4711_v14  ;;  %v1067_v19 = vadd.s32 1, %v4712_v8  ;;  %v2254_v13 = vadd.f32 %v2253_v21, %v2252_v56  ;;  %vm1727_vm15 = vcmp.lt.s32.totalorder %v1726_v52, 2 }
  0xe5   : > { %v3741_v39 = vpop.eup %3740  ;;  %vm1731_vm1 = vcmp.eq.s32.totalorder %v1726_v52, 2  ;;  %v980_v57 = vshrl.u32 %v962_v60, %v978_v36  ;;  %v983_v11 = vadd.s32 127, %v982_v47  ;;  %vm1728_vm2 = vcmp.eq.s32.totalorder %v1726_v52, 0 }
  0xe6   : > { %v3743_v46 = vpop.eup %3742  ;;  %v902_v35 = vxor.u32 2147483648, %v3741_v39  ;;  %v1068_v26 = vsel %vm1066_vm14, %v1067_v19, %v4712_v8  ;;  %v2255_v41 = vrot.slane %v2254_v13, 4  ;;  %vm895_vm4 = vweird.f32 %v4297_v62 }
  0xe7   : > { %v899_v43 = vxor.u32 2147483648, %v3743_v46  ;;  %v981_v45 = vor.u32 %v980_v57, %v979_v10  ;;  %v984_v5 = vshll.u32 %v983_v11, 23  ;;  %v1069_v53 = vadd.s32 %v1068_v26, %v1064_v16 }
  0xe8   : > { %v1733_v17 = vsel %vm1731_vm1, %v902_v35, %v3743_v46  ;;  %v903_v31 = vsel %vm901_vm12, %v902_v35, %v3743_v46  ;;  %v2256_v34 = vadd.f32 %v2255_v41, %v2254_v13  ;;  %vm908_vm5 = vcmp.lt.s32.totalorder %v4409_v61, 0 }
  0xe9   : > { %v1730_v32 = vsel %vm1728_vm2, %v3741_v39, %v899_v43  ;;  %v900_v25 = vsel %vm898_vm11, %v3741_v39, %v899_v43  ;;  %v985_v6 = vor.u32 4788187, %v984_v5  ;;  %v988_v40 = vcvt.s32.f32 %v981_v45 }
  0xea   : > { %v1734_v33 = vsel %vm1727_vm15, %v1730_v32, %v1733_v17  ;;  %v904_v24 = vsel %vm897_vm10, %v900_v25, %v903_v31  ;;  %v1070_v49 = vadd.s32 536870912, %v1069_v53  ;;  %v2257_v42 = vrot.slane %v2256_v34, 2 }
  0xeb   : > { %v1735_v37 = vsel %vm895_vm4, nan, %v1734_v33  ;;  %v905_v62 = vsel %vm895_vm4, nan, %v904_v24  ;;  %v986_v30 = vand.u32 2147483647, %v985_v6  ;;  %v992_v52 = vsub.s32 4, %v4644_v59 }
  0xec   : > { %3500 = vmatmul.mubr.msk.f32.gmra.mxu0 %vm1954_vm3, %v1735_v37  ;;  %3516 = vmatmul.mubr.msk.f32.gmra.mxu1 %vm1954_vm3, %v905_v62  ;;  %v4738_v22 = vshrl.u32 %v1070_v49, 30  ;;  %v2258_v54 = vadd.f32 %v2257_v42, %v2256_v34  ;;  %vm907_vm6 = vcmp.le.f32.partialorder %v906_v0, 0.7853982  ;;  %v1065_v0 = vadd.s32 %v4711_v14, %v4706_v50 }
  0xed   : > { %v989_v18 = vmul.f32 %v988_v40, %v986_v30  ;;  %v993_v48 = vsel %vm908_vm5, %v992_v52, %v4644_v59  ;;  %vm998_vm9 = vweird.f32 %v4409_v61  ;;  %vm1011_vm2 = vcmp.lt.s32.totalorder %v4491_v28, 0 }
  0xee   : > { %v1072_v38 = vshll.u32 %v4738_v22, 30  ;;  %v2259_v55 = vrot.slane %v2258_v54, 1  ;;  %v995_v4 = vsel %vm907_vm6, 0, %v993_v48  ;;  %v1095_v33 = vsub.s32 4, %v4738_v22 }
  0xef   : > { %v990_v58 = vxor.u32 2147483648, %v989_v18  ;;  %v1829_v8 = vadd.s32 3, %v995_v4  ;;  %v999_v60 = vand.u32 3, %v995_v4  ;;  %vm1010_vm4 = vcmp.le.f32.partialorder %v1009_v20, 0.7853982 }
  0xf0   : > { %v1073_v15 = vsub.s32 %v1069_v53, %v1072_v38  ;;  %v2260_v44 = vadd.f32 %v2259_v55, %v2258_v54  ;;  %v1096_v37 = vsel %vm1011_vm2, %v1095_v33, %v4738_v22 }
  0xf1   : > { %v991_v63 = vsel %vm908_vm5, %v990_v58, %v989_v18  ;;  %v1830_v21 = vand.u32 3, %v1829_v8  ;;  %vm1000_vm13 = vcmp.lt.s32.totalorder %v999_v60, 2  ;;  %vm1001_vm0 = vcmp.eq.s32.totalorder %v999_v60, 0 }
  0xf2   : > { %v994_v1 = vsel %vm907_vm6, %v4409_v61, %v991_v63  ;;  %v1075_v3 = vsub.s32 0, %v1073_v15  ;;  %vm1004_vm11 = vcmp.eq.s32.totalorder %v999_v60, 2  ;;  %vm2263_vm15 = vcmp.eq.f32.partialorder %v2260_v44, inf }
  0xf3   : > { %3744 = vcosq.f32 %v994_v1  ;;  %vm1835_vm10 = vcmp.eq.s32.totalorder %v1830_v21, 2  ;;  %vm1831_vm12 = vcmp.lt.s32.totalorder %v1830_v21, 2  ;;  %vm1832_vm14 = vcmp.eq.s32.totalorder %v1830_v21, 0  ;;  %v4777_v21 = vld [vmem:[#allocation2 + $0x20] ss:$0 sm:$0xff] }
  0xf4   : > { %3746 = vsinq.f32 %v994_v1  ;;  %v3285_v51 = vmin.u32 %v1075_v3, %v1073_v15  ;;  %v2266_v35 = vand.u32 2147483648, %v2260_v44  ;;  %vm2265_vm1 = vcmp.eq.f32.partialorder %v2260_v44, 0.0 }
  0xf5   : > { %3748 = vrsqrt.f32 %v2260_v44  ;;  %v1098_v62 = vsel %vm1010_vm4, 0, %v1096_v37 }
  0xf6   : > { %v1077_v23 = vclz %v3285_v51  ;;  %v1933_v30 = vadd.s32 3, %v1098_v62  ;;  %v1102_v18 = vand.u32 3, %v1098_v62 }
  0xf8   : > { %v3286_v2 = vadd.s32 4294967294, %v1077_v23  ;;  %v1934_v54 = vand.u32 3, %v1933_v30  ;;  %vm1107_vm6 = vcmp.eq.s32.totalorder %v1102_v18, 2 }
  0xfa   : > { %vm3287_vm7 = vcmp.lt.s32.totalorder %v3286_v2, 0  ;;  %vm1939_vm5 = vcmp.eq.s32.totalorder %v1934_v54, 2 }
  0xfb   : > { %v1080_v56 = vsel %vm3287_vm7, 0, %v3286_v2  ;;  %vm1936_vm7 = vcmp.eq.s32.totalorder %v1934_v54, 0 }
  0xfc   : > { %v1081_v29 = vsub.s32 32, %v1080_v56  ;;  %v1082_v59 = vshll.u32 %v1073_v15, %v1080_v56  ;;  %v1085_v36 = vsub.s32 4294967266, %v1080_v56 }
  0xfe   : > { %v1083_v10 = vshrl.u32 %v1065_v0, %v1081_v29  ;;  %v1086_v47 = vadd.s32 127, %v1085_v36  ;;  %v4788_v36 = vld [vmem:[%s271_s14 + $0x8] sm:$0xff] }
 0x100   : > { %v3745_v16 = vpop.eup %3744  ;;  %v1084_v19 = vor.u32 %v1083_v10, %v1082_v59  ;;  %v1087_v13 = vshll.u32 %v1086_v47, 23  ;;  %v4786_v59 = vld [vmem:[%s271_s14] sm:$0xff]  ;;  %v2670_v47 = vmul.f32 %v4788_v36, %v4788_v36 }
 0x101   : > { %v3747_v39 = vpop.eup %3746  ;;  %v1005_v50 = vxor.u32 2147483648, %v3745_v16  ;;  %v2669_v10 = vmul.f32 %v4786_v59, %v4786_v59 }
 0x102   : > { %v3749_v14 = vpop.eup %3748  ;;  %v1002_v57 = vxor.u32 2147483648, %v3747_v39  ;;  %v1088_v11 = vor.u32 4788187, %v1087_v13  ;;  %v1091_v46 = vcvt.s32.f32 %v1084_v19 }
 0x103   : > { %v1837_v26 = vsel %vm1835_vm10, %v1005_v50, %v3747_v39  ;;  %v1006_v41 = vsel %vm1004_vm11, %v1005_v50, %v3747_v39  ;;  %v2262_v43 = vmul.f32 %v3749_v14, %v2260_v44  ;;  %vm1101_vm10 = vweird.f32 %v4491_v28  ;;  %v4800_v50 = vld [vmem:[%s271_s14 + $0x18] sm:$0xff] }
 0x104   : > { %v1834_v45 = vsel %vm1832_vm14, %v3745_v16, %v1002_v57  ;;  %v1003_v5 = vsel %vm1001_vm0, %v3745_v16, %v1002_v57  ;;  %v1089_v53 = vand.u32 2147483647, %v1088_v11  ;;  %vm1103_vm0 = vcmp.lt.s32.totalorder %v1102_v18, 2  ;;  %v4794_v16 = vld [vmem:[%s271_s14 + $0x10] sm:$0xff] }
 0x105   : > { %v1838_v17 = vsel %vm1831_vm12, %v1834_v45, %v1837_v26  ;;  %v1007_v31 = vsel %vm1000_vm13, %v1003_v5, %v1006_v41  ;;  %v2264_v34 = vsel %vm2263_vm15, %v2260_v44, %v2262_v43  ;;  %vm1935_vm13 = vcmp.lt.s32.totalorder %v1934_v54, 2 }
 0x106   : > { %v1839_v32 = vsel %vm998_vm9, nan, %v1838_v17  ;;  %v1008_v25 = vsel %vm998_vm9, nan, %v1007_v31  ;;  %v1092_v6 = vmul.f32 %v1091_v46, %v1089_v53  ;;  %v2267_v40 = vsel %vm2265_vm1, %v2266_v35, %v2264_v34 }
 0x107   : > { %3502 = vmatprep.mubr.msk.f32.mxu0 %vm1954_vm3, %v1839_v32  ;;  %3518 = vmatprep.mubr.msk.f32.mxu1 %vm1954_vm3, %v1008_v25  ;;  %v2268_v24 = vmax.f32 %v2267_v40, 1e-12  ;;  %vm1104_vm9 = vcmp.eq.s32.totalorder %v1102_v18, 0  ;;  %v2671_v19 = vmul.f32 %v4794_v16, %v4794_v16  ;;  %v2673_v13 = vsel %vm2247_vm8, %v2669_v10, 0.0 }
 0x108   : > { %v1093_v49 = vxor.u32 2147483648, %v1092_v6  ;;  %v2674_v39 = vsel %vm2247_vm8, %v2670_v47, 0.0  ;;  %v2672_v57 = vmul.f32 %v4800_v50, %v4800_v50 }
 0x109   : > { %3750 = vrcp.f32 %v2268_v24  ;;  %v2675_v14 = vadd.f32 %v2674_v39, %v2673_v13  ;;  %v2676_v11 = vsel %vm2247_vm8, %v2671_v19, 0.0  ;;  %v2703_v39 = vld [vmem:[#allocation2 + $0xe0] sm:$0xff] }
 0x10a   : > { %v1094_v42 = vsel %vm1011_vm2, %v1093_v49, %v1092_v6  ;;  %v2678_v35 = vsel %vm2247_vm8, %v2672_v57, 0.0 }
 0x10b   : > { %v1097_v61 = vsel %vm1010_vm4, %v4491_v28, %v1094_v42  ;;  %v2677_v46 = vadd.f32 %v2676_v11, %v2675_v14  ;;  %v2702_v14 = vld [vmem:[#allocation2 + $0xd8] sm:$0xff] }
 0x10c   : > { %3752 = vcosq.f32 %v1097_v61 }
 0x10d   : > { %3754 = vsinq.f32 %v1097_v61  ;;  %v2679_v26 = vadd.f32 %v2678_v35, %v2677_v46 }
 0x10f   : > { %v2680_v41 = vrot.slane %v2679_v26, 4 }
 0x111   : > { %v2681_v43 = vadd.f32 %v2680_v41, %v2679_v26  ;;  %v2701_v26 = vld [vmem:[#allocation2 + $0xd0] sm:$0xff]  ;;  %v2700_v41 = vld [vmem:[#allocation2 + $0xc8] sm:$0xff] }
 0x113   : > { %v2682_v45 = vrot.slane %v2681_v43, 2 }
 0x115   : > { %v2683_v5 = vadd.f32 %v2682_v45, %v2681_v43 }
 0x116   : > { %v3751_v52 = vpop.eup %3750 }
 0x117   : > { %v2270_v48 = vmul.f32 %v3751_v52, %v4639_v9  ;;  %v2271_v23 = vmul.f32 %v3751_v52, %v4664_v12  ;;  %v2272_v28 = vmul.f32 %v3751_v52, %v4673_v27  ;;  %v2273_v8 = vmul.f32 %v3751_v52, %v4676_v7  ;;  %v2521_v7 = vld [vmem:[#allocation2 + $0xa8] sm:$0xff] }
 0x118   : > { %3563 = vmatprep.subr.mxu0 %v2521_v7  ;;  %v2684_v53 = vrot.slane %v2683_v5, 1 }
 0x119   : > { %v3753_v38 = vpop.eup %3752 }
 0x11a   : > { %v3755_v55 = vpop.eup %3754  ;;  %v1108_v58 = vxor.u32 2147483648, %v3753_v38  ;;  %v2685_v17 = vadd.f32 %v2684_v53, %v2683_v5  ;;  %v2699_v5 = vld [vmem:[#allocation2 + $0xc0] sm:$0xff] }
 0x11b   : > { %v1105_v20 = vxor.u32 2147483648, %v3755_v55 }
 0x11c   : > { %v1941_v22 = vsel %vm1939_vm5, %v1108_v58, %v3755_v55  ;;  %v1109_v15 = vsel %vm1107_vm6, %v1108_v58, %v3755_v55  ;;  %3756 = vrsqrt.f32 %v2685_v17  ;;  %vm2688_vm11 = vcmp.eq.f32.partialorder %v2685_v17, inf }
 0x11d   : > { %v1938_v63 = vsel %vm1936_vm7, %v3753_v38, %v1105_v20  ;;  %v1106_v44 = vsel %vm1104_vm9, %v3753_v38, %v1105_v20  ;;  %v2691_v42 = vand.u32 2147483648, %v2685_v17  ;;  %vm2690_vm12 = vcmp.eq.f32.partialorder %v2685_v17, 0.0  ;;  %v3339_v38 = vld [vmem:[#allocation2 + $0x70] ss:$0 sm:$0xff] }
 0x11e   : > { %v1942_v1 = vsel %vm1935_vm13, %v1938_v63, %v1941_v22  ;;  %v1110_v3 = vsel %vm1103_vm0, %v1106_v44, %v1109_v15 }
 0x11f   : > { %v1943_v51 = vsel %vm1101_vm10, nan, %v1942_v1  ;;  %v1111_v4 = vsel %vm1101_vm10, nan, %v1110_v3 }
 0x120   : > { %3503 = vmatmul.mubr.msk.f32.gmra.mxu0 %vm1954_vm3, %v1943_v51  ;;  %3519 = vmatmul.mubr.msk.f32.gmra.mxu1 %vm1954_vm3, %v1111_v4  ;;  %vm2388_vm3 = vcmask 261120  }
 0x121   : > { %3537 = vmatprep.mubr.msk.f32.mxu0 %vm2247_vm8, %v2270_v48 }
 0x124   : > { %3538 = vmatmul.mubr.msk.f32.vlgmr.msra.gmra.mxu0 %vm2247_vm8, %v2271_v23 }
 0x125   : > { %3540 = vmatprep.mubr.msk.f32.mxu0 %vm2247_vm8, %v2272_v28  ;;  %3564 = vmatpush3.msra.mxu0 %v2521_v7 }
 0x128   : > { %3541 = vmatmul.mubr.msk.f32.gmra.mxu0 %vm2247_vm8, %v2273_v8  ;;  %v2706_v8 = vld [vmem:[#allocation2 + $0xf8] sm:$0xff] }
 0x129   : > { %v3757_v25 = vpop.eup %3756 }
 0x12a   : > { %v2687_v33 = vmul.f32 %v3757_v25, %v2685_v17 }
 0x12c   : > { %v2689_v61 = vsel %vm2688_vm11, %v2685_v17, %v2687_v33  ;;  %v2520_v17 = vld [vmem:[#allocation2 + $0xa0] sm:$0xff] }
 0x12d   : > { %v2692_v54 = vsel %vm2690_vm12, %v2691_v42, %v2689_v61  ;;  %3565 = vmatprep.subr.mxu0 %v2520_v17 }
 0x12e   : > { %v2693_v58 = vmax.f32 %v2692_v54, 1e-12  ;;  %3566 = vmatpush3.msra.mxu0 %v2520_v17 }
 0x130   : > { %3758 = vrcp.f32 %v2693_v58 }
 0x13d   : > { %v3759_v57 = vpop.eup %3758 }
 0x13e   : > { %v2695_v43 = vmul.f32 %v3759_v57, %v4786_v59  ;;  %v2697_v53 = vmul.f32 %v3759_v57, %v4794_v16  ;;  %v2698_v59 = vmul.f32 %v3759_v57, %v4800_v50 }
 0x140   : > { %v3495_v9 = vpop.f32.mrf.mxu0 }
 0x141   : > { %v3511_v2 = vpop.f32.mrf.mxu1 }
 0x142   : > { %v4775_v0 = vadd.f32 %v3511_v2, %v3495_v9  ;;  %v2047_v60 = vpop.f32.mrf.mxu0 }
 0x143   : > { %v2178_v56 = vpop.f32.mrf.mxu1 }
 0x144   : > { %v2179_v12 = vadd.f32 %v2178_v56, %v2047_v60  ;;  %v2223_v48 = vadd.f32 %v4777_v21, %v4775_v0 }
 0x146   : > { %v2222_v27 = vadd.f32 %v4777_v21, %v2179_v12  ;;  %v2231_v9 = vmax.f32 %v2223_v48, 0.0  ;;  %v2945_v48 = vld [vmem:[#allocation2 + $0x138] sm:$0xff] }
 0x148   : > { %v2230_v29 = vmax.f32 %v2222_v27, 0.0  ;;  %v2705_v27 = vld [vmem:[#allocation2 + $0xf0] sm:$0xff] }
 0x14a   : > { %3551 = vmatprep.mubr.msk.f32.mxu1 %vm2388_vm3, %v2230_v29  ;;  %v2704_v29 = vld [vmem:[#allocation2 + $0xe8] sm:$0xff] }
 0x175   : > { %v3498_v31 = vpop.f32.mrf.mxu0  ;;  %v3514_v6 = vpop.f32.mrf.mxu1 }
 0x176   : > { %v2194_v1 = vadd.f32 %v3514_v6, %v3498_v31  ;;  %v2519_v31 = vld [vmem:[#allocation2 + $0x98] sm:$0xff] }
 0x177   : > { %v2057_v34 = vpop.f32.mrf.mxu0  ;;  %v2188_v24 = vpop.f32.mrf.mxu1  ;;  %3567 = vmatprep.subr.mxu0 %v2519_v31 }
 0x178   : > { %v2189_v22 = vadd.f32 %v2188_v24, %v2057_v34  ;;  %v2225_v2 = vadd.f32 %v4777_v21, %v2194_v1  ;;  %3568 = vmatpush3.msra.mxu0 %v2519_v31  ;;  %v3344_v34 = vld [vmem:[#allocation2 + $0x80] ss:$0 sm:$0xff]  ;;  %v3353_v1 = vld [vmem:[#allocation2 + $0xb0] ss:$0 sm:$0xff] }
 0x17a   : > { %v2224_v51 = vadd.f32 %v4777_v21, %v2189_v22  ;;  %v2233_v7 = vmax.f32 %v2225_v2, 0.0 }
 0x17c   : > { %v2232_v56 = vmax.f32 %v2224_v51, 0.0 }
 0x1ac   : > { %v3501_v32 = vpop.f32.mrf.mxu0  ;;  %v3517_v62 = vpop.f32.mrf.mxu1 }
 0x1ad   : > { %v2204_v60 = vadd.f32 %v3517_v62, %v3501_v32 }
 0x1ae   : > { %v2067_v40 = vpop.f32.mrf.mxu0  ;;  %v2198_v52 = vpop.f32.mrf.mxu1 }
 0x1af   : > { %v2199_v4 = vadd.f32 %v2198_v52, %v2067_v40  ;;  %v2227_v10 = vadd.f32 %v4777_v21, %v2204_v60 }
 0x1b1   : > { %v2226_v0 = vadd.f32 %v4777_v21, %v2199_v4  ;;  %v2235_v11 = vmax.f32 %v2227_v10, 0.0 }
 0x1b3   : > { %v2234_v19 = vmax.f32 %v2226_v0, 0.0 }
 0x1e0   : > { %v3504_v49 = vpop.f32.mrf.mxu0  ;;  %v3520_v63 = vpop.f32.mrf.mxu1 }
 0x1e1   : > { %v2214_v47 = vadd.f32 %v3520_v63, %v3504_v49 }
 0x1e2   : > { %v2077_v37 = vpop.f32.mrf.mxu0  ;;  %v2208_v23 = vpop.f32.mrf.mxu1 }
 0x1e3   : > { %v2209_v12 = vadd.f32 %v2208_v23, %v2077_v37  ;;  %v2229_v46 = vadd.f32 %v4777_v21, %v2214_v47 }
 0x1e4   : > { %v3539_v30 = vpop.f32.mrf.mxu0 }
 0x1e5   : > { %v2371_v3 = vadd.f32 %v3539_v30, %v3339_v38  ;;  %v2228_v13 = vadd.f32 %v4777_v21, %v2209_v12  ;;  %v2237_v45 = vmax.f32 %v2229_v46, 0.0  ;;  %v2696_v21 = vmul.f32 %v3759_v57, %v4788_v36  ;;  %v2518_v36 = vld [vmem:[#allocation2 + $0x90] sm:$0xff] }
 0x1e6   : > { %v2365_v18 = vpop.f32.mrf.mxu0  ;;  %3569 = vmatprep.subr.mxu0 %v2518_v36 }
 0x1e7   : > { %v2366_v28 = vadd.f32 %v3339_v38, %v2365_v18  ;;  %v2236_v35 = vmax.f32 %v2228_v13, 0.0  ;;  %3570 = vmatpush3.msra.mxu0 %v2518_v36 }
 0x1e8   : > { %v3542_v55 = vpop.f32.mrf.mxu0 }
 0x1e9   : > { %v2381_v20 = vadd.f32 %v3542_v55, %v3339_v38 }
 0x1ea   : > { %v2375_v15 = vpop.f32.mrf.mxu0 }
 0x1eb   : > { %v2376_v44 = vadd.f32 %v3339_v38, %v2375_v15  ;;  %3543 = vmatprep.subr.mxu1 %v2381_v20  ;;  %v3362_v38 = vld [vmem:[#allocation2 + $0x100] ss:$0 sm:$0xff] }
 0x1ec   : > { %3544 = vmatpush3.msra.mxu1 %v2381_v20 }
 0x1ed   : > { %3545 = vmatprep.subr.mxu1 %v2376_v44 }
 0x1ee   : > { %3546 = vmatpush3.msra.mxu1 %v2376_v44 }
 0x1ef   : > { %3547 = vmatprep.subr.mxu1 %v2371_v3 }
 0x1f0   : > { %3548 = vmatpush3.msra.mxu1 %v2371_v3 }
 0x1f1   : > { %3549 = vmatprep.subr.mxu1 %v2366_v28 }
 0x1f2   : > { %3550 = vmatpush3.msra.mxu1 %v2366_v28 }
 0x1f3   : > { %3552 = vmatmul.mubr.msk.f32.vlgmr.msra.gmra.mxu1 %vm2388_vm3, %v2231_v9  ;;  %3583 = vmatprep.subr.mxu1 %v2706_v8 }
 0x1f4   : > { %3554 = vmatprep.mubr.msk.f32.mxu1 %vm2388_vm3, %v2232_v56  ;;  %3584 = vmatpush3.msra.mxu1 %v2706_v8 }
 0x1f5   : > { %3585 = vmatprep.subr.mxu1 %v2705_v27 }
 0x1f6   : > { %3586 = vmatpush3.msra.mxu1 %v2705_v27 }
 0x1f7   : > { %3555 = vmatmul.mubr.msk.f32.gmra.mxu1 %vm2388_vm3, %v2233_v7  ;;  %3587 = vmatprep.subr.mxu1 %v2704_v29 }
 0x1f8   : > { %3557 = vmatprep.mubr.msk.f32.mxu1 %vm2388_vm3, %v2234_v19  ;;  %3588 = vmatpush3.msra.mxu1 %v2704_v29 }
 0x1f9   : > { %3589 = vmatprep.subr.mxu1 %v2703_v39 }
 0x1fa   : > { %3590 = vmatpush3.msra.mxu1 %v2703_v39 }
 0x1fb   : > { %3558 = vmatmul.mubr.msk.f32.gmra.mxu1 %vm2388_vm3, %v2235_v11  ;;  %3591 = vmatprep.subr.mxu1 %v2702_v14 }
 0x1fc   : > { %3560 = vmatprep.mubr.msk.f32.mxu1 %vm2388_vm3, %v2236_v35  ;;  %3592 = vmatpush3.msra.mxu1 %v2702_v14  ;;  %v2944_v35 = vld [vmem:[#allocation2 + $0x130] sm:$0xff] }
 0x1fd   : > { %3593 = vmatprep.subr.mxu1 %v2701_v26 }
 0x1fe   : > { %3594 = vmatpush3.msra.mxu1 %v2701_v26  ;;  %v2943_v26 = vld [vmem:[#allocation2 + $0x128] sm:$0xff] }
 0x1ff   : > { %3561 = vmatmul.mubr.msk.f32.gmra.mxu1 %vm2388_vm3, %v2237_v45  ;;  %3595 = vmatprep.subr.mxu1 %v2700_v41  ;;  %v3367_v45 = vld [vmem:[#allocation2 + $0x110] ss:$0 sm:$0xff] }
 0x200   : > { %3596 = vmatpush3.msra.mxu1 %v2700_v41  ;;  %3599 = vmatprep.mubr.msk.f32.mxu1 %vm2247_vm8, %v2695_v43  ;;  %v2942_v41 = vld [vmem:[#allocation2 + $0x120] sm:$0xff] }
 0x201   : > { %3597 = vmatprep.subr.mxu1 %v2699_v5 }
 0x202   : > { %3598 = vmatpush3.msra.mxu1 %v2699_v5 }
 0x203   : > { %3600 = vmatmul.mubr.msk.f32.vlgmr.msra.gmra.mxu1 %vm2247_vm8, %v2696_v21  ;;  %3625 = vmatprep.subr.mxu1 %v2945_v48 }
 0x204   : > { %3602 = vmatprep.mubr.msk.f32.mxu1 %vm2247_vm8, %v2697_v53  ;;  %3626 = vmatpush3.msra.mxu1 %v2945_v48 }
 0x205   : > { %3627 = vmatprep.subr.mxu1 %v2944_v35 }
 0x206   : > { %3628 = vmatpush3.msra.mxu1 %v2944_v35 }
 0x207   : > { %3603 = vmatmul.mubr.msk.f32.gmra.mxu1 %vm2247_vm8, %v2698_v59  ;;  %3629 = vmatprep.subr.mxu1 %v2943_v26  ;;  %vm3128_vm8 = vcmask 64512  }
 0x208   : > { %3630 = vmatpush3.msra.mxu1 %v2943_v26 }
 0x209   : > { %3631 = vmatprep.subr.mxu1 %v2942_v41 }
 0x20a   : > { %3632 = vmatpush3.msra.mxu1 %v2942_v41 }
 0x2b3   : > { %v3553_v16 = vpop.f32.mrf.mxu1 }
 0x2b4   : > { %v2485_v6 = vadd.f32 %v3553_v16, %v3344_v34 }
 0x2b5   : > { %v2479_v32 = vpop.f32.mrf.mxu1 }
 0x2b6   : > { %v2480_v25 = vadd.f32 %v3344_v34, %v2479_v32 }
 0x2b7   : > { %v3556_v40 = vpop.f32.mrf.mxu1 }
 0x2b8   : > { %3571 = vmatprep.mubr.msk.f32.mxu0 %vm2388_vm3, %v2480_v25  ;;  %v2495_v24 = vadd.f32 %v3556_v40, %v3344_v34 }
 0x2b9   : > { %v2489_v50 = vpop.f32.mrf.mxu1  ;;  %3572 = vmatmul.mubr.msk.f32.vlgmr.msra.gmra.mxu0 %vm2388_vm3, %v2485_v6 }
 0x2ba   : > { %v2490_v33 = vadd.f32 %v3344_v34, %v2489_v50 }
 0x2bb   : > { %v3559_v49 = vpop.f32.mrf.mxu1 }
 0x2bc   : > { %3574 = vmatprep.mubr.msk.f32.mxu0 %vm2388_vm3, %v2490_v33  ;;  %v2505_v61 = vadd.f32 %v3559_v49, %v3344_v34 }
 0x2bd   : > { %v2499_v42 = vpop.f32.mrf.mxu1  ;;  %3575 = vmatmul.mubr.msk.f32.gmra.mxu0 %vm2388_vm3, %v2495_v24  ;;  %v3376_v24 = vld [vmem:[#allocation2 + $0x140] ss:$0 sm:$0xff] }
 0x2be   : > { %v2500_v37 = vadd.f32 %v3344_v34, %v2499_v42 }
 0x2bf   : > { %v3562_v62 = vpop.f32.mrf.mxu1 }
 0x2c0   : > { %3577 = vmatprep.mubr.msk.f32.mxu0 %vm2388_vm3, %v2500_v37  ;;  %v2515_v18 = vadd.f32 %v3562_v62, %v3344_v34 }
 0x2c1   : > { %v2509_v30 = vpop.f32.mrf.mxu1  ;;  %3578 = vmatmul.mubr.msk.f32.gmra.mxu0 %vm2388_vm3, %v2505_v61 }
 0x2c2   : > { %v2510_v54 = vadd.f32 %v3344_v34, %v2509_v30 }
 0x2c3   : > { %v3601_v52 = vpop.f32.mrf.mxu1 }
 0x2c4   : > { %3580 = vmatprep.mubr.msk.f32.mxu0 %vm2388_vm3, %v2510_v54  ;;  %v2796_v15 = vadd.f32 %v3601_v52, %v3362_v38 }
 0x2c5   : > { %3581 = vmatmul.mubr.msk.f32.gmra.mxu0 %vm2388_vm3, %v2515_v18  ;;  %v2790_v55 = vpop.f32.mrf.mxu1 }
 0x2c6   : > { %v2791_v44 = vadd.f32 %v3362_v38, %v2790_v55 }
 0x2c7   : > { %v3604_v58 = vpop.f32.mrf.mxu1 }
 0x2c8   : > { %v2806_v20 = vadd.f32 %v3604_v58, %v3362_v38 }
 0x2c9   : > { %v2800_v22 = vpop.f32.mrf.mxu1 }
 0x2ca   : > { %v2801_v63 = vadd.f32 %v3362_v38, %v2800_v22  ;;  %3605 = vmatprep.subr.mxu0 %v2806_v20 }
 0x2cb   : > { %3606 = vmatpush3.msra.mxu0 %v2806_v20 }
 0x2cc   : > { %3607 = vmatprep.subr.mxu0 %v2801_v63 }
 0x2cd   : > { %3608 = vmatpush3.msra.mxu0 %v2801_v63 }
 0x2ce   : > { %3609 = vmatprep.subr.mxu0 %v2796_v15 }
 0x2cf   : > { %3610 = vmatpush3.msra.mxu0 %v2796_v15 }
 0x2d0   : > { %3611 = vmatprep.subr.mxu0 %v2791_v44 }
 0x2d1   : > { %3612 = vmatpush3.msra.mxu0 %v2791_v44 }
 0x379   : > { %v3573_v3 = vpop.f32.mrf.mxu0 }
 0x37a   : > { %v2623_v51 = vadd.f32 %v3573_v3, %v3353_v1 }
 0x37b   : > { %v2617_v4 = vpop.f32.mrf.mxu0 }
 0x37c   : > { %v2618_v23 = vadd.f32 %v3353_v1, %v2617_v4  ;;  %v2657_v9 = vmax.f32 %v2623_v51, 0.0 }
 0x37d   : > { %v3576_v28 = vpop.f32.mrf.mxu0 }
 0x37e   : > { %v2656_v8 = vmax.f32 %v2618_v23, 0.0  ;;  %v2633_v2 = vadd.f32 %v3576_v28, %v3353_v1 }
 0x37f   : > { %v2627_v60 = vpop.f32.mrf.mxu0 }
 0x380   : > { %v2628_v56 = vadd.f32 %v3353_v1, %v2627_v60  ;;  %3613 = vmatprep.mubr.msk.f32.mxu0 %vm2388_vm3, %v2656_v8  ;;  %v2659_v27 = vmax.f32 %v2633_v2, 0.0 }
 0x381   : > { %v3579_v0 = vpop.f32.mrf.mxu0  ;;  %3614 = vmatmul.mubr.msk.f32.vlgmr.msra.gmra.mxu0 %vm2388_vm3, %v2657_v9 }
 0x382   : > { %v2658_v12 = vmax.f32 %v2628_v56, 0.0  ;;  %v2643_v29 = vadd.f32 %v3579_v0, %v3353_v1 }
 0x383   : > { %v2637_v7 = vpop.f32.mrf.mxu0 }
 0x384   : > { %v2638_v10 = vadd.f32 %v3353_v1, %v2637_v7  ;;  %3616 = vmatprep.mubr.msk.f32.mxu0 %vm2388_vm3, %v2658_v12  ;;  %v2661_v13 = vmax.f32 %v2643_v29, 0.0 }
 0x385   : > { %v3582_v47 = vpop.f32.mrf.mxu0  ;;  %3617 = vmatmul.mubr.msk.f32.gmra.mxu0 %vm2388_vm3, %v2659_v27 }
 0x386   : > { %v2660_v19 = vmax.f32 %v2638_v10, 0.0  ;;  %v2653_v39 = vadd.f32 %v3582_v47, %v3353_v1 }
 0x387   : > { %v2647_v14 = vpop.f32.mrf.mxu0 }
 0x388   : > { %v2648_v57 = vadd.f32 %v3353_v1, %v2647_v14  ;;  %3619 = vmatprep.mubr.msk.f32.mxu0 %vm2388_vm3, %v2660_v19  ;;  %v2663_v46 = vmax.f32 %v2653_v39, 0.0 }
 0x389   : > { %3620 = vmatmul.mubr.msk.f32.gmra.mxu0 %vm2388_vm3, %v2661_v13 }
 0x38a   : > { %v2662_v11 = vmax.f32 %v2648_v57, 0.0 }
 0x38c   : > { %3622 = vmatprep.mubr.msk.f32.mxu0 %vm2388_vm3, %v2662_v11 }
 0x38d   : > { %3623 = vmatmul.mubr.msk.f32.gmra.mxu0 %vm2388_vm3, %v2663_v46 }
 0x441   : > { %v3615_v43 = vpop.f32.mrf.mxu0 }
 0x442   : > { %v2909_v53 = vadd.f32 %v3615_v43, %v3367_v45 }
 0x443   : > { %v2903_v5 = vpop.f32.mrf.mxu0 }
 0x444   : > { %v2904_v21 = vadd.f32 %v3367_v45, %v2903_v5 }
 0x445   : > { %v3618_v59 = vpop.f32.mrf.mxu0 }
 0x446   : > { %3633 = vmatprep.mubr.msk.f32.mxu1 %vm2388_vm3, %v2904_v21  ;;  %v2919_v36 = vadd.f32 %v3618_v59, %v3367_v45 }
 0x447   : > { %v2913_v17 = vpop.f32.mrf.mxu0  ;;  %3634 = vmatmul.mubr.msk.f32.vlgmr.msra.gmra.mxu1 %vm2388_vm3, %v2909_v53 }
 0x448   : > { %v2914_v31 = vadd.f32 %v3367_v45, %v2913_v17 }
 0x449   : > { %v3621_v16 = vpop.f32.mrf.mxu0 }
 0x44a   : > { %3636 = vmatprep.mubr.msk.f32.mxu1 %vm2388_vm3, %v2914_v31  ;;  %v2929_v25 = vadd.f32 %v3621_v16, %v3367_v45 }
 0x44b   : > { %v2923_v34 = vpop.f32.mrf.mxu0  ;;  %3637 = vmatmul.mubr.msk.f32.gmra.mxu1 %vm2388_vm3, %v2919_v36 }
 0x44c   : > { %v2924_v32 = vadd.f32 %v3367_v45, %v2923_v34 }
 0x44d   : > { %v3624_v6 = vpop.f32.mrf.mxu0 }
 0x44e   : > { %3639 = vmatprep.mubr.msk.f32.mxu1 %vm2388_vm3, %v2924_v32  ;;  %v2939_v33 = vadd.f32 %v3624_v6, %v3367_v45 }
 0x44f   : > { %v2933_v40 = vpop.f32.mrf.mxu0  ;;  %3640 = vmatmul.mubr.msk.f32.gmra.mxu1 %vm2388_vm3, %v2929_v25 }
 0x450   : > { %v2934_v50 = vadd.f32 %v3367_v45, %v2933_v40 }
 0x452   : > { %3642 = vmatprep.mubr.msk.f32.mxu1 %vm2388_vm3, %v2934_v50 }
 0x453   : > { %3643 = vmatmul.mubr.msk.f32.gmra.mxu1 %vm2388_vm3, %v2939_v33 }
 0x507   : > { %v3635_v49 = vpop.f32.mrf.mxu1 }
 0x508   : > { %v3047_v42 = vadd.f32 %v3635_v49, %v3376_v24 }
 0x509   : > { %v3041_v37 = vpop.f32.mrf.mxu1 }
 0x50a   : > { %v3386_v61 = vmul.f32 -1.442695, %v3047_v42  ;;  %v3042_v62 = vadd.f32 %v3376_v24, %v3041_v37 }
 0x50b   : > { %v3638_v30 = vpop.f32.mrf.mxu1 }
 0x50c   : > { %3760 = vpow2.f32 %v3386_v61  ;;  %v3385_v54 = vmul.f32 -1.442695, %v3042_v62  ;;  %v3057_v18 = vadd.f32 %v3638_v30, %v3376_v24 }
 0x50d   : > { %v3051_v52 = vpop.f32.mrf.mxu1 }
 0x50e   : > { %3762 = vpow2.f32 %v3385_v54  ;;  %v3388_v38 = vmul.f32 -1.442695, %v3057_v18  ;;  %v3052_v55 = vadd.f32 %v3376_v24, %v3051_v52 }
 0x50f   : > { %v3641_v58 = vpop.f32.mrf.mxu1 }
 0x510   : > { %3764 = vpow2.f32 %v3388_v38  ;;  %v3387_v20 = vmul.f32 -1.442695, %v3052_v55  ;;  %v3067_v22 = vadd.f32 %v3641_v58, %v3376_v24 }
 0x511   : > { %v3061_v15 = vpop.f32.mrf.mxu1 }
 0x512   : > { %3766 = vpow2.f32 %v3387_v20  ;;  %v3390_v63 = vmul.f32 -1.442695, %v3067_v22  ;;  %v3062_v44 = vadd.f32 %v3376_v24, %v3061_v15 }
 0x513   : > { %v3644_v48 = vpop.f32.mrf.mxu1 }
 0x514   : > { %3768 = vpow2.f32 %v3390_v63  ;;  %v3389_v1 = vmul.f32 -1.442695, %v3062_v44  ;;  %v3077_v3 = vadd.f32 %v3644_v48, %v3376_v24 }
 0x515   : > { %v3071_v51 = vpop.f32.mrf.mxu1 }
 0x516   : > { %3770 = vpow2.f32 %v3389_v1  ;;  %v3392_v4 = vmul.f32 -1.442695, %v3077_v3  ;;  %v3072_v23 = vadd.f32 %v3376_v24, %v3071_v51 }
 0x518   : > { %3772 = vpow2.f32 %v3392_v4  ;;  %v3391_v28 = vmul.f32 -1.442695, %v3072_v23 }
 0x519   : > { %v3761_v8 = vpop.eup %3760 }
 0x51a   : > { %v3105_v9 = vadd.f32 1.0, %v3761_v8  ;;  %3774 = vpow2.f32 %v3391_v28 }
 0x51b   : > { %v3763_v2 = vpop.eup %3762 }
 0x51c   : > { %3776 = vrcp.f32 %v3105_v9  ;;  %v3104_v60 = vadd.f32 1.0, %v3763_v2 }
 0x51d   : > { %v3765_v56 = vpop.eup %3764 }
 0x51e   : > { %3778 = vrcp.f32 %v3104_v60  ;;  %v3107_v0 = vadd.f32 1.0, %v3765_v56 }
 0x51f   : > { %v3767_v12 = vpop.eup %3766 }
 0x520   : > { %3780 = vrcp.f32 %v3107_v0  ;;  %v3106_v27 = vadd.f32 1.0, %v3767_v12 }
 0x521   : > { %v3769_v29 = vpop.eup %3768 }
 0x522   : > { %3782 = vrcp.f32 %v3106_v27  ;;  %v3109_v7 = vadd.f32 1.0, %v3769_v29 }
 0x523   : > { %v3771_v10 = vpop.eup %3770 }
 0x524   : > { %3784 = vrcp.f32 %v3109_v7  ;;  %v3108_v47 = vadd.f32 1.0, %v3771_v10 }
 0x525   : > { %v3773_v19 = vpop.eup %3772 }
 0x526   : > { %3786 = vrcp.f32 %v3108_v47  ;;  %v3111_v13 = vadd.f32 1.0, %v3773_v19 }
 0x527   : > { %v3775_v39 = vpop.eup %3774 }
 0x528   : > { %3788 = vrcp.f32 %v3111_v13  ;;  %v3110_v14 = vadd.f32 1.0, %v3775_v39 }
 0x529   : > { %v3777_v57 = vpop.eup %3776 }
 0x52a   : > { %3130 = vst.msk [vmem:[%s277_s20 + $0x8] sm:$0xff] %vm3128_vm8, %v3777_v57  ;;  %3790 = vrcp.f32 %v3110_v14 }
 0x52b   : > { %v3779_v11 = vpop.eup %3778 }
 0x52c   : > { %3129 = vst.msk [vmem:[%s277_s20] sm:$0xff] %vm3128_vm8, %v3779_v11 }
 0x52d   : > { %v3781_v46 = vpop.eup %3780 }
 0x52e   : > { %3132 = vst.msk [vmem:[%s277_s20 + $0x18] sm:$0xff] %vm3128_vm8, %v3781_v46 }
 0x52f   : > { %v3783_v35 = vpop.eup %3782 }
 0x530   : > { %3131 = vst.msk [vmem:[%s277_s20 + $0x10] sm:$0xff] %vm3128_vm8, %v3783_v35 }
 0x531   : > { %v3785_v26 = vpop.eup %3784 }
 0x532   : > { %3134 = vst.msk [vmem:[%s277_s20 + $0x28] sm:$0xff] %vm3128_vm8, %v3785_v26 }
 0x533   : > { %v3787_v41 = vpop.eup %3786 }
 0x534   : > { %3133 = vst.msk [vmem:[%s277_s20 + $0x20] sm:$0xff] %vm3128_vm8, %v3787_v41 }
 0x535   : > { %v3789_v43 = vpop.eup %3788 }
 0x536   : > { %3136 = vst.msk [vmem:[%s277_s20 + $0x38] sm:$0xff] %vm3128_vm8, %v3789_v43 }
 0x537   : > { %v3791_v45 = vpop.eup %3790 }
 0x538   : > { %3135 = vst.msk [vmem:[%s277_s20 + $0x30] sm:$0xff] %vm3128_vm8, %v3791_v45 }
 0x539 PF: > { %s15_s17 = sadd.s32 1, %s3844_s17   ;;  %s4894_s15 = smov %s3840_s16 }
 0x53a   : > { %p12_p3 = scmp.ge.s32.totalorder %s15_s17, 4   ;;  %s4895_s16 = smov %s4897_s19 }
 0x53c   :  { %14 = sbr.rel (!%p12_p3) target bundleno = 2 (0x2), region = 77 }
 0x541   :  { %3162 = vsyncpa [#allocation3], 1 }
 0x542   :  { %3164 = vsyncpa [#allocation3 + $0x1], 1 }

</bundles_post_ra>
